<compile_context>
chip_gen: v7x
topology: tpu7x:2x2x1
jax: 0.10.0
libtpu: 0.0.40
codegen_flags: <defaults>
</compile_context>

<pallas_src>
import functools

import jax
import jax.numpy as jnp
from jax import lax
from jax.experimental import pallas as pl
from jax.experimental.pallas import tpu as pltpu

HEADS = 5            # GATConv heads in the reference module
GAT_NEG_SLOPE = 0.2  # GATConv attention LeakyReLU slope
ACT_NEG_SLOPE = 0.01 # nn.LeakyReLU default slope
NEG_BIG = -1e30      # masks padding rows out of the attention softmax


def _leaky(x, slope):
    return jnp.where(x >= 0, x, x * slope)


def _gat_pool_kernel(feat_ref, nmask_ref, pwv_ref, wf_ref, bias_ref, out_ref,
                     *, n_pathways, n_nodes_pad, hidden, heads, nlayers,
                     batch_tile, temperature, gat_weight):
    P, NP, H, BT = n_pathways, n_nodes_pad, hidden, batch_tile

    # fused weight column layout (see wrapper):
    #   [0, heads*H)                : W_h^T per head        -> xp_h
    #   [heads*H, heads*H + H)      : mean_h W_h^T           -> self-loop output
    #   next `heads` columns        : W_h^T @ att_src_h      -> a_src per head
    #   next `heads` columns        : W_h^T @ att_dst_h      -> a_dst per head
    C_MEAN = heads * H
    C_SRC = C_MEAN + H
    C_DST = C_SRC + heads

    feat = feat_ref[0]                  # (BT*NP, H)  pathway feats / pooled vec / zero pad
    nmask = nmask_ref[0]                # (BT*NP, 1)  mask rows, 1 for pooled, 0 for pad
    pwv = pwv_ref[...]                  # (P, 1)
    wf = wf_ref[...]                    # (H, NF_pad)
    bias = bias_ref[...]                # (1, H)

    nodes = feat * nmask                # masked node features (pooled row passes through)

    # ---------------- pooling / skip branch (cheap, per batch element) ------
    inv_temp = 1.0 / temperature
    skips = []
    for b in range(BT):
        base = b * NP                   # NP is a multiple of 8 -> aligned slices
        m_b = nmask[base:base + P, :]   # (P, 1)
        xm_b = nodes[base:base + P, :]  # (P, H)  == tensor * mask
        mw = (pwv * m_b) * inv_temp
        mw = mw - jnp.max(mw, axis=0, keepdims=True)
        ew = jnp.exp(mw)
        p_w = ew * pl.reciprocal(jnp.sum(ew, axis=0, keepdims=True), approx=True)
        denom = jnp.sum(m_b, axis=0, keepdims=True)            # (1, 1)
        denom = jnp.where(denom == 0.0, 1.0, denom)
        scale = float(P) * pl.reciprocal(denom, approx=True)
        skips.append(jnp.sum(xm_b * p_w, axis=0, keepdims=True) * scale)   # (1, H)

    # ---------------- GAT layers: one fused matmul per layer ----------------
    row = lax.broadcasted_iota(jnp.int32, (NP, 1), 0)
    valid = row < (P + 1)               # real graph nodes (drops sublane padding)
    is_pool = row == P                  # pooled (target) node
    inv_heads = 1.0 / float(heads)

    for _ in range(nlayers):
        # (BT*NP, H) @ (H, 256): all heads + attention projections + head-mean.
        xp = jnp.dot(nodes, wf, preferred_element_type=jnp.float32)
        new_rows = []
        for b in range(BT):
            base = b * NP
            xp_b = xp[base:base + NP, :]                           # (NP, NF_pad)
            out_other = xp_b[:, C_MEAN:C_MEAN + H] + bias          # self-loop mean_h
            a_src = xp_b[:, C_SRC:C_SRC + heads]                   # (NP, heads)
            a_dst_pool = xp_b[P:P + 1, C_DST:C_DST + heads]        # (1, heads), pooled row only

            e = _leaky(a_src + a_dst_pool, GAT_NEG_SLOPE)
            e = jnp.where(valid, e, NEG_BIG)                       # mask padding rows
            e = e - jnp.max(e, axis=0, keepdims=True)
            ex = jnp.exp(e)
            alpha = ex * pl.reciprocal(jnp.sum(ex, axis=0, keepdims=True),
                                       approx=True)                # (NP, heads)

            acc_pool = jnp.zeros((1, H), jnp.float32)
            for hd in range(heads):
                acc_pool = acc_pool + jnp.sum(
                    alpha[:, hd:hd + 1] * xp_b[:, hd * H:(hd + 1) * H],
                    axis=0, keepdims=True)
            out_pool = acc_pool * inv_heads + bias                 # (1, H)

            out_b = jnp.where(is_pool, out_pool, out_other)        # (NP, H)
            new_rows.append(_leaky(out_b, ACT_NEG_SLOPE))
        nodes = jnp.concatenate(new_rows, axis=0)                  # (BT*NP, H), 8-aligned pieces

    # ---------------- combine and store (lane-dense (1, BT*H) block) --------
    gw = gat_weight
    for b in range(BT):
        gat_b = nodes[b * NP + P:b * NP + P + 1, :]                # pooled node features
        res_b = gat_b * gw + skips[b] * (1.0 - gw)                 # (1, H)
        out_ref[:, b * H:(b + 1) * H] = res_b


def gat_pool_forward(tensor, mask, params, config, *, batch_tile=None):
    """tensor: (B, H, P) float32, mask: (B, 1, P) float32 -> (B, H) float32."""
    B, H, P = tensor.shape
    heads = HEADS
    nlayers = int(config["pool_nlayers"])
    temperature = float(config["softmax_temperature"])
    gat_weight = float(config["gat_weight"])

    NP = ((P + 1 + 7) // 8) * 8                  # nodes (P pathways + pooled) padded to sublanes
    if batch_tile is None:
        batch_tile = max(1, min(B, 8))           # bigger tiles -> lane-dense output, fuller MXU M
    BT = batch_tile
    num_blocks = (B + BT - 1) // BT
    B_pad = num_blocks * BT

    tensor_t = jnp.transpose(tensor, (0, 2, 1)).astype(jnp.float32)   # (B, P, H)
    mask_t = jnp.transpose(mask, (0, 2, 1)).astype(jnp.float32)       # (B, P, 1)
    pooled = params["pooled_vec"].reshape(1, H).astype(jnp.float32)

    # Node slab: [pathway features (unmasked) | pooled vec | zero padding].
    node_feat = jnp.zeros((B_pad, NP, H), jnp.float32)
    node_feat = node_feat.at[:B, :P, :].set(tensor_t)
    node_feat = node_feat.at[:, P, :].set(pooled[0])
    # Node mask: [pathway mask | 1 for pooled node | 0 for padding].
    node_mask = jnp.zeros((B_pad, NP, 1), jnp.float32)
    node_mask = node_mask.at[:B, :P, :].set(mask_t)
    node_mask = node_mask.at[:, P, :].set(1.0)
    # Flatten batch tile into the node (M) dimension — layout plumbing in the wrapper.
    node_feat = node_feat.reshape(num_blocks, BT * NP, H)
    node_mask = node_mask.reshape(num_blocks, BT * NP, 1)

    pwv = params["pathway_weight_vector"].reshape(P, 1).astype(jnp.float32)
    bias = params["bias"].reshape(1, H).astype(jnp.float32)

    # ---- fused per-layer weight --------------------------------------------
    W = params["lin_weight"].reshape(heads, H, H).astype(jnp.float32)   # (heads, H_out, H_in)
    Wt = jnp.transpose(W, (0, 2, 1))                                    # (heads, H_in, H_out)
    asrc = params["att_src"].reshape(heads, H).astype(jnp.float32)
    adst = params["att_dst"].reshape(heads, H).astype(jnp.float32)
    w_heads = jnp.transpose(Wt, (1, 0, 2)).reshape(H, heads * H)        # per-head xp columns
    w_mean = jnp.mean(Wt, axis=0)                                       # self-loop mean (has /heads)
    w_src = jnp.einsum("kio,ko->ik", Wt, asrc)                          # (H, heads)
    w_dst = jnp.einsum("kio,ko->ik", Wt, adst)                          # (H, heads)
    wf = jnp.concatenate([w_heads, w_mean, w_src, w_dst], axis=1)       # (H, heads*H + H + 2*heads)
    nf = wf.shape[1]
    nf_pad = ((nf + 127) // 128) * 128
    wf = jnp.pad(wf, ((0, 0), (0, nf_pad - nf)))                        # lane-pad to 128 multiple

    kernel = functools.partial(
        _gat_pool_kernel,
        n_pathways=P, n_nodes_pad=NP, hidden=H, heads=heads,
        nlayers=nlayers, batch_tile=BT,
        temperature=temperature, gat_weight=gat_weight)

    out_flat = pl.pallas_call(
        kernel,
        out_shape=jax.ShapeDtypeStruct((num_blocks, BT * H), jnp.float32),
        grid_spec=pltpu.PrefetchScalarGridSpec(
            num_scalar_prefetch=0,
            grid=(num_blocks,),
            in_specs=[
                pl.BlockSpec((1, BT * NP, H), lambda i: (i, 0, 0)),   # node features
                pl.BlockSpec((1, BT * NP, 1), lambda i: (i, 0, 0)),   # node mask
                pl.BlockSpec((P, 1), lambda i: (0, 0)),               # pathway_weight_vector
                pl.BlockSpec((H, nf_pad), lambda i: (0, 0)),          # fused GAT weight
                pl.BlockSpec((1, H), lambda i: (0, 0)),               # GAT bias
            ],
            out_specs=pl.BlockSpec((1, BT * H), lambda i: (i, 0)),    # lane-dense output block
        ),
        compiler_params=pltpu.CompilerParams(dimension_semantics=("parallel",)),
    )(node_feat, node_mask, pwv, wf, bias)

    return out_flat.reshape(B_pad, H)[:B]


# ---------------------------- pure-JAX reference ----------------------------
def gat_pool_reference(tensor, mask, params, config):
    heads = HEADS
    B, H, P = tensor.shape
    temperature = float(config["softmax_temperature"])
    gw = float(config["gat_weight"])

    t = tensor * mask                                                  # (B,H,P)
    mwv = params["pathway_weight_vector"][None] * mask                 # (B,1,P)
    p_w = jax.nn.softmax(mwv / temperature, axis=-1)[None]             # (1,B,1,P)
    h = (t[None] * p_w)[0]                                             # (B,H,P)
    denom = mask.sum(-1)[..., None]                                    # (B,1,1)
    denom = jnp.where(denom == 0, 1.0, denom)
    h = h * P / denom
    skip = h.sum(-1)                                                   # (B,H)

    pooled = jnp.tile(params["pooled_vec"], (B, 1))[..., None]         # (B,H,1)
    t = jnp.concatenate([t, pooled], axis=-1)                          # (B,H,P+1)

    W3 = params["lin_weight"].reshape(heads, H, H)
    asrc = params["att_src"].reshape(heads, H)
    adst = params["att_dst"].reshape(heads, H)
    bias = params["bias"]

    for _ in range(int(config["pool_nlayers"])):
        nodes = jnp.transpose(t, (0, 2, 1))                            # (B,P+1,H)
        xp = jnp.einsum("bnh,koh->bnko", nodes, W3,
                        precision=lax.Precision.HIGHEST)               # (B,P+1,heads,H)
        a_src = jnp.einsum("bnko,ko->bnk", xp, asrc)
        a_dst = jnp.einsum("bnko,ko->bnk", xp, adst)
        e = a_src + a_dst[:, -1:, :]                                   # target = pooled node
        e = jnp.where(e >= 0, e, 0.2 * e)
        alpha = jax.nn.softmax(e, axis=1)
        out_pool = jnp.einsum("bnk,bnko->bko", alpha, xp).mean(1)      # (B,H)
        out_other = xp.mean(2)                                         # (B,P+1,H)
        out = out_other.at[:, -1, :].set(out_pool) + bias[None, None, :]
        nodes = jnp.where(out >= 0, out, 0.01 * out)
        t = jnp.transpose(nodes, (0, 2, 1))

    return t[:, :, -1] * gw + skip * (1 - gw)


if __name__ == "__main__":
    B, H, P = 2, 32, 8
    config = {
        "pool_nlayers": 2,
        "item_hidden_size": H,
        "softmax_temperature": 0.5,
        "gat_weight": 0.7,
    }

    key = jax.random.PRNGKey(0)
    k_t, k_m, k_pw, k_pv, k_w, k_as, k_ad, k_b = jax.random.split(key, 8)

    tensor = jax.random.normal(k_t, (B, H, P), dtype=jnp.float32)
    mask = (jax.random.uniform(k_m, (B, 1, P)) > 0.3).astype(jnp.float32)

    eps = 1e-3
    params = {
        "pathway_weight_vector": jax.random.normal(k_pw, (1, P), jnp.float32) * eps,
        "pooled_vec": jax.random.normal(k_pv, (1, H), jnp.float32) * eps,
        "lin_weight": jax.random.normal(k_w, (HEADS * H, H), jnp.float32) / jnp.sqrt(H),
        "att_src": jax.random.normal(k_as, (1, HEADS, H), jnp.float32) * 0.1,
        "att_dst": jax.random.normal(k_ad, (1, HEADS, H), jnp.float32) * 0.1,
        "bias": jax.random.normal(k_b, (H,), jnp.float32) * eps,
    }

    out = gat_pool_forward(tensor, mask, params, config)
    out = jax.block_until_ready(out)

    ref = gat_pool_reference(tensor, mask, params, config)
    assert out.shape == (B, H), out.shape
    assert bool(jnp.all(jnp.isfinite(out)))
    max_err = float(jnp.max(jnp.abs(out - ref)))
    assert max_err < 1e-1, f"mismatch vs reference: {max_err}"

    print("KERNEL_OK")
</pallas_src>

<mosaic_0001>
module attributes {stable_mosaic.version = 11 : i64} {
  func.func @_gat_pool_kernel(%arg0: i32, %arg1: memref<1x32x32xf32, #tpu.memory_space<vmem>>, %arg2: memref<1x32x1xf32, #tpu.memory_space<vmem>>, %arg3: memref<8x1xf32, #tpu.memory_space<vmem>>, %arg4: memref<32x256xf32, #tpu.memory_space<vmem>>, %arg5: memref<1x32xf32, #tpu.memory_space<vmem>>, %arg6: memref<1x64xf32, #tpu.memory_space<vmem>>) attributes {dimension_semantics = [#tpu.dimension_semantics<parallel>], iteration_bounds = array<i64: 1>, scalar_prefetch = 0 : i64, scratch_operands = 0 : i64, tpu.core_type = #tpu.core_type<tc>, window_params = [{transform_indices = @transform_0, window_bounds = array<i64: 1, 32, 32>}, {transform_indices = @transform_1, window_bounds = array<i64: 1, 32, 1>}, {pipeline_mode = #tpu.pipeline_mode<synchronous>, transform_indices = @transform_2, window_bounds = array<i64: 8, 1>}, {pipeline_mode = #tpu.pipeline_mode<synchronous>, transform_indices = @transform_3, window_bounds = array<i64: 32, 256>}, {pipeline_mode = #tpu.pipeline_mode<synchronous>, transform_indices = @transform_4, window_bounds = array<i64: 1, 32>}, {transform_indices = @transform_5, window_bounds = array<i64: 1, 64>}]} {
    %c0 = arith.constant 0 : index
    %c0_0 = arith.constant 0 : index
    %c0_1 = arith.constant 0 : index
    %0 = vector.load %arg1[%c0, %c0_0, %c0_1] : memref<1x32x32xf32, #tpu.memory_space<vmem>>, vector<1x32x32xf32>
    %1 = vector.shape_cast %0 : vector<1x32x32xf32> to vector<32x32xf32>
    %c0_2 = arith.constant 0 : index
    %c0_3 = arith.constant 0 : index
    %c0_4 = arith.constant 0 : index
    %2 = vector.load %arg2[%c0_2, %c0_3, %c0_4] : memref<1x32x1xf32, #tpu.memory_space<vmem>>, vector<1x32x1xf32>
    %3 = vector.shape_cast %2 : vector<1x32x1xf32> to vector<32x1xf32>
    %c0_5 = arith.constant 0 : index
    %c0_6 = arith.constant 0 : index
    %4 = vector.load %arg3[%c0_5, %c0_6] : memref<8x1xf32, #tpu.memory_space<vmem>>, vector<8x1xf32>
    %c0_7 = arith.constant 0 : index
    %c0_8 = arith.constant 0 : index
    %5 = vector.load %arg4[%c0_7, %c0_8] : memref<32x256xf32, #tpu.memory_space<vmem>>, vector<32x256xf32>
    %c0_9 = arith.constant 0 : index
    %c0_10 = arith.constant 0 : index
    %6 = vector.load %arg5[%c0_9, %c0_10] : memref<1x32xf32, #tpu.memory_space<vmem>>, vector<1x32xf32>
    %7 = vector.broadcast %3 : vector<32x1xf32> to vector<32x32xf32>
    %8 = arith.mulf %1, %7 : vector<32x32xf32>
    %9 = vector.extract_strided_slice %3 {offsets = [0, 0], sizes = [8, 1], strides = [1, 1]} : vector<32x1xf32> to vector<8x1xf32>
    %10 = vector.extract_strided_slice %8 {offsets = [0, 0], sizes = [8, 32], strides = [1, 1]} : vector<32x32xf32> to vector<8x32xf32>
    %11 = arith.mulf %4, %9 : vector<8x1xf32>
    %cst = arith.constant 2.000000e+00 : f32
    %12 = vector.broadcast %cst : f32 to vector<8x1xf32>
    %13 = arith.mulf %11, %12 : vector<8x1xf32>
    %cst_11 = arith.constant dense<0xFF800000> : vector<1xf32>
    %14 = vector.multi_reduction <maximumf>, %13, %cst_11 [0] : vector<8x1xf32> to vector<1xf32>
    %15 = vector.shape_cast %14 : vector<1xf32> to vector<1x1xf32>
    %16 = vector.broadcast %15 : vector<1x1xf32> to vector<8x1xf32>
    %17 = arith.subf %13, %16 : vector<8x1xf32>
    %18 = math.exp %17 : vector<8x1xf32>
    %cst_12 = arith.constant dense<0.000000e+00> : vector<1xf32>
    %19 = vector.multi_reduction <add>, %18, %cst_12 [0] : vector<8x1xf32> to vector<1xf32>
    %20 = vector.shape_cast %19 : vector<1xf32> to vector<1x1xf32>
    %21 = tpu.reciprocal %20 {approx = true} : vector<1x1xf32> -> vector<1x1xf32>
    %22 = vector.broadcast %21 : vector<1x1xf32> to vector<8x1xf32>
    %23 = arith.mulf %18, %22 : vector<8x1xf32>
    %cst_13 = arith.constant dense<0.000000e+00> : vector<1xf32>
    %24 = vector.multi_reduction <add>, %9, %cst_13 [0] : vector<8x1xf32> to vector<1xf32>
    %25 = vector.shape_cast %24 : vector<1xf32> to vector<1x1xf32>
    %cst_14 = arith.constant 0.000000e+00 : f32
    %26 = vector.broadcast %cst_14 : f32 to vector<1x1xf32>
    %27 = arith.cmpf oeq, %25, %26 : vector<1x1xf32>
    %cst_15 = arith.constant 1.000000e+00 : f32
    %28 = vector.broadcast %cst_15 : f32 to vector<1x1xf32>
    %29 = arith.select %27, %28, %25 : vector<1x1xi1>, vector<1x1xf32>
    %30 = tpu.reciprocal %29 {approx = true} : vector<1x1xf32> -> vector<1x1xf32>
    %cst_16 = arith.constant 8.000000e+00 : f32
    %31 = vector.broadcast %cst_16 : f32 to vector<1x1xf32>
    %32 = arith.mulf %31, %30 : vector<1x1xf32>
    %33 = vector.broadcast %23 : vector<8x1xf32> to vector<8x32xf32>
    %34 = arith.mulf %10, %33 : vector<8x32xf32>
    %cst_17 = arith.constant dense<0.000000e+00> : vector<32xf32>
    %35 = vector.multi_reduction <add>, %34, %cst_17 [0] : vector<8x32xf32> to vector<32xf32>
    %36 = vector.shape_cast %35 : vector<32xf32> to vector<1x32xf32>
    %37 = vector.broadcast %32 : vector<1x1xf32> to vector<1x32xf32>
    %38 = arith.mulf %36, %37 : vector<1x32xf32>
    %39 = vector.extract_strided_slice %3 {offsets = [16, 0], sizes = [8, 1], strides = [1, 1]} : vector<32x1xf32> to vector<8x1xf32>
    %40 = vector.extract_strided_slice %8 {offsets = [16, 0], sizes = [8, 32], strides = [1, 1]} : vector<32x32xf32> to vector<8x32xf32>
    %41 = arith.mulf %4, %39 : vector<8x1xf32>
    %cst_18 = arith.constant 2.000000e+00 : f32
    %42 = vector.broadcast %cst_18 : f32 to vector<8x1xf32>
    %43 = arith.mulf %41, %42 : vector<8x1xf32>
    %cst_19 = arith.constant dense<0xFF800000> : vector<1xf32>
    %44 = vector.multi_reduction <maximumf>, %43, %cst_19 [0] : vector<8x1xf32> to vector<1xf32>
    %45 = vector.shape_cast %44 : vector<1xf32> to vector<1x1xf32>
    %46 = vector.broadcast %45 : vector<1x1xf32> to vector<8x1xf32>
    %47 = arith.subf %43, %46 : vector<8x1xf32>
    %48 = math.exp %47 : vector<8x1xf32>
    %cst_20 = arith.constant dense<0.000000e+00> : vector<1xf32>
    %49 = vector.multi_reduction <add>, %48, %cst_20 [0] : vector<8x1xf32> to vector<1xf32>
    %50 = vector.shape_cast %49 : vector<1xf32> to vector<1x1xf32>
    %51 = tpu.reciprocal %50 {approx = true} : vector<1x1xf32> -> vector<1x1xf32>
    %52 = vector.broadcast %51 : vector<1x1xf32> to vector<8x1xf32>
    %53 = arith.mulf %48, %52 : vector<8x1xf32>
    %cst_21 = arith.constant dense<0.000000e+00> : vector<1xf32>
    %54 = vector.multi_reduction <add>, %39, %cst_21 [0] : vector<8x1xf32> to vector<1xf32>
    %55 = vector.shape_cast %54 : vector<1xf32> to vector<1x1xf32>
    %cst_22 = arith.constant 0.000000e+00 : f32
    %56 = vector.broadcast %cst_22 : f32 to vector<1x1xf32>
    %57 = arith.cmpf oeq, %55, %56 : vector<1x1xf32>
    %cst_23 = arith.constant 1.000000e+00 : f32
    %58 = vector.broadcast %cst_23 : f32 to vector<1x1xf32>
    %59 = arith.select %57, %58, %55 : vector<1x1xi1>, vector<1x1xf32>
    %60 = tpu.reciprocal %59 {approx = true} : vector<1x1xf32> -> vector<1x1xf32>
    %cst_24 = arith.constant 8.000000e+00 : f32
    %61 = vector.broadcast %cst_24 : f32 to vector<1x1xf32>
    %62 = arith.mulf %61, %60 : vector<1x1xf32>
    %63 = vector.broadcast %53 : vector<8x1xf32> to vector<8x32xf32>
    %64 = arith.mulf %40, %63 : vector<8x32xf32>
    %cst_25 = arith.constant dense<0.000000e+00> : vector<32xf32>
    %65 = vector.multi_reduction <add>, %64, %cst_25 [0] : vector<8x32xf32> to vector<32xf32>
    %66 = vector.shape_cast %65 : vector<32xf32> to vector<1x32xf32>
    %67 = vector.broadcast %62 : vector<1x1xf32> to vector<1x32xf32>
    %68 = arith.mulf %66, %67 : vector<1x32xf32>
    %69 = tpu.iota {dimensions = array<i32: 0>} : vector<16x1xi32>
    %c9_i32 = arith.constant 9 : i32
    %70 = vector.broadcast %c9_i32 : i32 to vector<16x1xi32>
    %71 = arith.cmpi slt, %69, %70 : vector<16x1xi32>
    %c8_i32 = arith.constant 8 : i32
    %72 = vector.broadcast %c8_i32 : i32 to vector<16x1xi32>
    %73 = arith.cmpi eq, %69, %72 : vector<16x1xi32>
    %cst_26 = arith.constant dense<0.000000e+00> : vector<32x256xf32>
    %74 = tpu.matmul %8, %5, %cst_26 {dimension_numbers = #tpu.dot_dimension_numbers<[1], [0], [0], [1], [0, 0, 1, 1], [], []>} : vector<32x32xf32>, vector<32x256xf32>, vector<32x256xf32> -> vector<32x256xf32>
    %75 = vector.extract_strided_slice %74 {offsets = [0, 0], sizes = [16, 256], strides = [1, 1]} : vector<32x256xf32> to vector<16x256xf32>
    %76 = vector.extract_strided_slice %75 {offsets = [0, 160], sizes = [16, 32], strides = [1, 1]} : vector<16x256xf32> to vector<16x32xf32>
    %77 = vector.broadcast %6 : vector<1x32xf32> to vector<16x32xf32>
    %78 = arith.addf %76, %77 : vector<16x32xf32>
    %79 = vector.extract_strided_slice %75 {offsets = [0, 192], sizes = [16, 5], strides = [1, 1]} : vector<16x256xf32> to vector<16x5xf32>
    %80 = vector.extract_strided_slice %75 {offsets = [8, 197], sizes = [1, 5], strides = [1, 1]} : vector<16x256xf32> to vector<1x5xf32>
    %81 = vector.broadcast %80 : vector<1x5xf32> to vector<16x5xf32>
    %82 = arith.addf %79, %81 : vector<16x5xf32>
    %cst_27 = arith.constant 0.000000e+00 : f32
    %83 = vector.broadcast %cst_27 : f32 to vector<16x5xf32>
    %84 = arith.cmpf oge, %82, %83 : vector<16x5xf32>
    %cst_28 = arith.constant 2.000000e-01 : f32
    %85 = vector.broadcast %cst_28 : f32 to vector<16x5xf32>
    %86 = arith.mulf %82, %85 : vector<16x5xf32>
    %87 = arith.select %84, %82, %86 : vector<16x5xi1>, vector<16x5xf32>
    %cst_29 = arith.constant -1.000000e+30 : f32
    %88 = vector.shape_cast %71 : vector<16x1xi1> to vector<16x1xi1>
    %89 = vector.broadcast %88 : vector<16x1xi1> to vector<16x5xi1>
    %90 = vector.broadcast %cst_29 : f32 to vector<16x5xf32>
    %91 = arith.select %89, %87, %90 : vector<16x5xi1>, vector<16x5xf32>
    %cst_30 = arith.constant dense<0xFF800000> : vector<5xf32>
    %92 = vector.multi_reduction <maximumf>, %91, %cst_30 [0] : vector<16x5xf32> to vector<5xf32>
    %93 = vector.shape_cast %92 : vector<5xf32> to vector<1x5xf32>
    %94 = vector.broadcast %93 : vector<1x5xf32> to vector<16x5xf32>
    %95 = arith.subf %91, %94 : vector<16x5xf32>
    %96 = math.exp %95 : vector<16x5xf32>
    %cst_31 = arith.constant dense<0.000000e+00> : vector<5xf32>
    %97 = vector.multi_reduction <add>, %96, %cst_31 [0] : vector<16x5xf32> to vector<5xf32>
    %98 = vector.shape_cast %97 : vector<5xf32> to vector<1x5xf32>
    %99 = tpu.reciprocal %98 {approx = true} : vector<1x5xf32> -> vector<1x5xf32>
    %100 = vector.broadcast %99 : vector<1x5xf32> to vector<16x5xf32>
    %101 = arith.mulf %96, %100 : vector<16x5xf32>
    %cst_32 = arith.constant 0.000000e+00 : f32
    %102 = vector.broadcast %cst_32 : f32 to vector<1x32xf32>
    %103 = vector.extract_strided_slice %101 {offsets = [0, 0], sizes = [16, 1], strides = [1, 1]} : vector<16x5xf32> to vector<16x1xf32>
    %104 = vector.extract_strided_slice %75 {offsets = [0, 0], sizes = [16, 32], strides = [1, 1]} : vector<16x256xf32> to vector<16x32xf32>
    %105 = vector.broadcast %103 : vector<16x1xf32> to vector<16x32xf32>
    %106 = arith.mulf %105, %104 : vector<16x32xf32>
    %cst_33 = arith.constant dense<0.000000e+00> : vector<32xf32>
    %107 = vector.multi_reduction <add>, %106, %cst_33 [0] : vector<16x32xf32> to vector<32xf32>
    %108 = vector.shape_cast %107 : vector<32xf32> to vector<1x32xf32>
    %109 = arith.addf %102, %108 : vector<1x32xf32>
    %110 = vector.extract_strided_slice %101 {offsets = [0, 1], sizes = [16, 1], strides = [1, 1]} : vector<16x5xf32> to vector<16x1xf32>
    %111 = vector.extract_strided_slice %75 {offsets = [0, 32], sizes = [16, 32], strides = [1, 1]} : vector<16x256xf32> to vector<16x32xf32>
    %112 = vector.broadcast %110 : vector<16x1xf32> to vector<16x32xf32>
    %113 = arith.mulf %112, %111 : vector<16x32xf32>
    %cst_34 = arith.constant dense<0.000000e+00> : vector<32xf32>
    %114 = vector.multi_reduction <add>, %113, %cst_34 [0] : vector<16x32xf32> to vector<32xf32>
    %115 = vector.shape_cast %114 : vector<32xf32> to vector<1x32xf32>
    %116 = arith.addf %109, %115 : vector<1x32xf32>
    %117 = vector.extract_strided_slice %101 {offsets = [0, 2], sizes = [16, 1], strides = [1, 1]} : vector<16x5xf32> to vector<16x1xf32>
    %118 = vector.extract_strided_slice %75 {offsets = [0, 64], sizes = [16, 32], strides = [1, 1]} : vector<16x256xf32> to vector<16x32xf32>
    %119 = vector.broadcast %117 : vector<16x1xf32> to vector<16x32xf32>
    %120 = arith.mulf %119, %118 : vector<16x32xf32>
    %cst_35 = arith.constant dense<0.000000e+00> : vector<32xf32>
    %121 = vector.multi_reduction <add>, %120, %cst_35 [0] : vector<16x32xf32> to vector<32xf32>
    %122 = vector.shape_cast %121 : vector<32xf32> to vector<1x32xf32>
    %123 = arith.addf %116, %122 : vector<1x32xf32>
    %124 = vector.extract_strided_slice %101 {offsets = [0, 3], sizes = [16, 1], strides = [1, 1]} : vector<16x5xf32> to vector<16x1xf32>
    %125 = vector.extract_strided_slice %75 {offsets = [0, 96], sizes = [16, 32], strides = [1, 1]} : vector<16x256xf32> to vector<16x32xf32>
    %126 = vector.broadcast %124 : vector<16x1xf32> to vector<16x32xf32>
    %127 = arith.mulf %126, %125 : vector<16x32xf32>
    %cst_36 = arith.constant dense<0.000000e+00> : vector<32xf32>
    %128 = vector.multi_reduction <add>, %127, %cst_36 [0] : vector<16x32xf32> to vector<32xf32>
    %129 = vector.shape_cast %128 : vector<32xf32> to vector<1x32xf32>
    %130 = arith.addf %123, %129 : vector<1x32xf32>
    %131 = vector.extract_strided_slice %101 {offsets = [0, 4], sizes = [16, 1], strides = [1, 1]} : vector<16x5xf32> to vector<16x1xf32>
    %132 = vector.extract_strided_slice %75 {offsets = [0, 128], sizes = [16, 32], strides = [1, 1]} : vector<16x256xf32> to vector<16x32xf32>
    %133 = vector.broadcast %131 : vector<16x1xf32> to vector<16x32xf32>
    %134 = arith.mulf %133, %132 : vector<16x32xf32>
    %cst_37 = arith.constant dense<0.000000e+00> : vector<32xf32>
    %135 = vector.multi_reduction <add>, %134, %cst_37 [0] : vector<16x32xf32> to vector<32xf32>
    %136 = vector.shape_cast %135 : vector<32xf32> to vector<1x32xf32>
    %137 = arith.addf %130, %136 : vector<1x32xf32>
    %cst_38 = arith.constant 2.000000e-01 : f32
    %138 = vector.broadcast %cst_38 : f32 to vector<1x32xf32>
    %139 = arith.mulf %137, %138 : vector<1x32xf32>
    %140 = arith.addf %139, %6 : vector<1x32xf32>
    %141 = vector.shape_cast %73 : vector<16x1xi1> to vector<16x1xi1>
    %142 = vector.broadcast %141 : vector<16x1xi1> to vector<16x32xi1>
    %143 = vector.shape_cast %140 : vector<1x32xf32> to vector<1x32xf32>
    %144 = vector.broadcast %143 : vector<1x32xf32> to vector<16x32xf32>
    %145 = arith.select %142, %144, %78 : vector<16x32xi1>, vector<16x32xf32>
    %cst_39 = arith.constant 0.000000e+00 : f32
    %146 = vector.broadcast %cst_39 : f32 to vector<16x32xf32>
    %147 = arith.cmpf oge, %145, %146 : vector<16x32xf32>
    %cst_40 = arith.constant 0.00999999977 : f32
    %148 = vector.broadcast %cst_40 : f32 to vector<16x32xf32>
    %149 = arith.mulf %145, %148 : vector<16x32xf32>
    %150 = arith.select %147, %145, %149 : vector<16x32xi1>, vector<16x32xf32>
    %151 = vector.extract_strided_slice %74 {offsets = [16, 0], sizes = [16, 256], strides = [1, 1]} : vector<32x256xf32> to vector<16x256xf32>
    %152 = vector.extract_strided_slice %151 {offsets = [0, 160], sizes = [16, 32], strides = [1, 1]} : vector<16x256xf32> to vector<16x32xf32>
    %153 = vector.broadcast %6 : vector<1x32xf32> to vector<16x32xf32>
    %154 = arith.addf %152, %153 : vector<16x32xf32>
    %155 = vector.extract_strided_slice %151 {offsets = [0, 192], sizes = [16, 5], strides = [1, 1]} : vector<16x256xf32> to vector<16x5xf32>
    %156 = vector.extract_strided_slice %151 {offsets = [8, 197], sizes = [1, 5], strides = [1, 1]} : vector<16x256xf32> to vector<1x5xf32>
    %157 = vector.broadcast %156 : vector<1x5xf32> to vector<16x5xf32>
    %158 = arith.addf %155, %157 : vector<16x5xf32>
    %cst_41 = arith.constant 0.000000e+00 : f32
    %159 = vector.broadcast %cst_41 : f32 to vector<16x5xf32>
    %160 = arith.cmpf oge, %158, %159 : vector<16x5xf32>
    %cst_42 = arith.constant 2.000000e-01 : f32
    %161 = vector.broadcast %cst_42 : f32 to vector<16x5xf32>
    %162 = arith.mulf %158, %161 : vector<16x5xf32>
    %163 = arith.select %160, %158, %162 : vector<16x5xi1>, vector<16x5xf32>
    %cst_43 = arith.constant -1.000000e+30 : f32
    %164 = vector.shape_cast %71 : vector<16x1xi1> to vector<16x1xi1>
    %165 = vector.broadcast %164 : vector<16x1xi1> to vector<16x5xi1>
    %166 = vector.broadcast %cst_43 : f32 to vector<16x5xf32>
    %167 = arith.select %165, %163, %166 : vector<16x5xi1>, vector<16x5xf32>
    %cst_44 = arith.constant dense<0xFF800000> : vector<5xf32>
    %168 = vector.multi_reduction <maximumf>, %167, %cst_44 [0] : vector<16x5xf32> to vector<5xf32>
    %169 = vector.shape_cast %168 : vector<5xf32> to vector<1x5xf32>
    %170 = vector.broadcast %169 : vector<1x5xf32> to vector<16x5xf32>
    %171 = arith.subf %167, %170 : vector<16x5xf32>
    %172 = math.exp %171 : vector<16x5xf32>
    %cst_45 = arith.constant dense<0.000000e+00> : vector<5xf32>
    %173 = vector.multi_reduction <add>, %172, %cst_45 [0] : vector<16x5xf32> to vector<5xf32>
    %174 = vector.shape_cast %173 : vector<5xf32> to vector<1x5xf32>
    %175 = tpu.reciprocal %174 {approx = true} : vector<1x5xf32> -> vector<1x5xf32>
    %176 = vector.broadcast %175 : vector<1x5xf32> to vector<16x5xf32>
    %177 = arith.mulf %172, %176 : vector<16x5xf32>
    %cst_46 = arith.constant 0.000000e+00 : f32
    %178 = vector.broadcast %cst_46 : f32 to vector<1x32xf32>
    %179 = vector.extract_strided_slice %177 {offsets = [0, 0], sizes = [16, 1], strides = [1, 1]} : vector<16x5xf32> to vector<16x1xf32>
    %180 = vector.extract_strided_slice %151 {offsets = [0, 0], sizes = [16, 32], strides = [1, 1]} : vector<16x256xf32> to vector<16x32xf32>
    %181 = vector.broadcast %179 : vector<16x1xf32> to vector<16x32xf32>
    %182 = arith.mulf %181, %180 : vector<16x32xf32>
    %cst_47 = arith.constant dense<0.000000e+00> : vector<32xf32>
    %183 = vector.multi_reduction <add>, %182, %cst_47 [0] : vector<16x32xf32> to vector<32xf32>
    %184 = vector.shape_cast %183 : vector<32xf32> to vector<1x32xf32>
    %185 = arith.addf %178, %184 : vector<1x32xf32>
    %186 = vector.extract_strided_slice %177 {offsets = [0, 1], sizes = [16, 1], strides = [1, 1]} : vector<16x5xf32> to vector<16x1xf32>
    %187 = vector.extract_strided_slice %151 {offsets = [0, 32], sizes = [16, 32], strides = [1, 1]} : vector<16x256xf32> to vector<16x32xf32>
    %188 = vector.broadcast %186 : vector<16x1xf32> to vector<16x32xf32>
    %189 = arith.mulf %188, %187 : vector<16x32xf32>
    %cst_48 = arith.constant dense<0.000000e+00> : vector<32xf32>
    %190 = vector.multi_reduction <add>, %189, %cst_48 [0] : vector<16x32xf32> to vector<32xf32>
    %191 = vector.shape_cast %190 : vector<32xf32> to vector<1x32xf32>
    %192 = arith.addf %185, %191 : vector<1x32xf32>
    %193 = vector.extract_strided_slice %177 {offsets = [0, 2], sizes = [16, 1], strides = [1, 1]} : vector<16x5xf32> to vector<16x1xf32>
    %194 = vector.extract_strided_slice %151 {offsets = [0, 64], sizes = [16, 32], strides = [1, 1]} : vector<16x256xf32> to vector<16x32xf32>
    %195 = vector.broadcast %193 : vector<16x1xf32> to vector<16x32xf32>
    %196 = arith.mulf %195, %194 : vector<16x32xf32>
    %cst_49 = arith.constant dense<0.000000e+00> : vector<32xf32>
    %197 = vector.multi_reduction <add>, %196, %cst_49 [0] : vector<16x32xf32> to vector<32xf32>
    %198 = vector.shape_cast %197 : vector<32xf32> to vector<1x32xf32>
    %199 = arith.addf %192, %198 : vector<1x32xf32>
    %200 = vector.extract_strided_slice %177 {offsets = [0, 3], sizes = [16, 1], strides = [1, 1]} : vector<16x5xf32> to vector<16x1xf32>
    %201 = vector.extract_strided_slice %151 {offsets = [0, 96], sizes = [16, 32], strides = [1, 1]} : vector<16x256xf32> to vector<16x32xf32>
    %202 = vector.broadcast %200 : vector<16x1xf32> to vector<16x32xf32>
    %203 = arith.mulf %202, %201 : vector<16x32xf32>
    %cst_50 = arith.constant dense<0.000000e+00> : vector<32xf32>
    %204 = vector.multi_reduction <add>, %203, %cst_50 [0] : vector<16x32xf32> to vector<32xf32>
    %205 = vector.shape_cast %204 : vector<32xf32> to vector<1x32xf32>
    %206 = arith.addf %199, %205 : vector<1x32xf32>
    %207 = vector.extract_strided_slice %177 {offsets = [0, 4], sizes = [16, 1], strides = [1, 1]} : vector<16x5xf32> to vector<16x1xf32>
    %208 = vector.extract_strided_slice %151 {offsets = [0, 128], sizes = [16, 32], strides = [1, 1]} : vector<16x256xf32> to vector<16x32xf32>
    %209 = vector.broadcast %207 : vector<16x1xf32> to vector<16x32xf32>
    %210 = arith.mulf %209, %208 : vector<16x32xf32>
    %cst_51 = arith.constant dense<0.000000e+00> : vector<32xf32>
    %211 = vector.multi_reduction <add>, %210, %cst_51 [0] : vector<16x32xf32> to vector<32xf32>
    %212 = vector.shape_cast %211 : vector<32xf32> to vector<1x32xf32>
    %213 = arith.addf %206, %212 : vector<1x32xf32>
    %cst_52 = arith.constant 2.000000e-01 : f32
    %214 = vector.broadcast %cst_52 : f32 to vector<1x32xf32>
    %215 = arith.mulf %213, %214 : vector<1x32xf32>
    %216 = arith.addf %215, %6 : vector<1x32xf32>
    %217 = vector.shape_cast %73 : vector<16x1xi1> to vector<16x1xi1>
    %218 = vector.broadcast %217 : vector<16x1xi1> to vector<16x32xi1>
    %219 = vector.shape_cast %216 : vector<1x32xf32> to vector<1x32xf32>
    %220 = vector.broadcast %219 : vector<1x32xf32> to vector<16x32xf32>
    %221 = arith.select %218, %220, %154 : vector<16x32xi1>, vector<16x32xf32>
    %cst_53 = arith.constant 0.000000e+00 : f32
    %222 = vector.broadcast %cst_53 : f32 to vector<16x32xf32>
    %223 = arith.cmpf oge, %221, %222 : vector<16x32xf32>
    %cst_54 = arith.constant 0.00999999977 : f32
    %224 = vector.broadcast %cst_54 : f32 to vector<16x32xf32>
    %225 = arith.mulf %221, %224 : vector<16x32xf32>
    %226 = arith.select %223, %221, %225 : vector<16x32xi1>, vector<16x32xf32>
    %227 = tpu.concatenate %150, %226 in 0 : vector<16x32xf32>, vector<16x32xf32> -> vector<32x32xf32>
    %cst_55 = arith.constant dense<0.000000e+00> : vector<32x256xf32>
    %228 = tpu.matmul %227, %5, %cst_55 {dimension_numbers = #tpu.dot_dimension_numbers<[1], [0], [0], [1], [0, 0, 1, 1], [], []>} : vector<32x32xf32>, vector<32x256xf32>, vector<32x256xf32> -> vector<32x256xf32>
    %229 = vector.extract_strided_slice %228 {offsets = [0, 0], sizes = [16, 256], strides = [1, 1]} : vector<32x256xf32> to vector<16x256xf32>
    %230 = vector.extract_strided_slice %229 {offsets = [0, 160], sizes = [16, 32], strides = [1, 1]} : vector<16x256xf32> to vector<16x32xf32>
    %231 = vector.broadcast %6 : vector<1x32xf32> to vector<16x32xf32>
    %232 = arith.addf %230, %231 : vector<16x32xf32>
    %233 = vector.extract_strided_slice %229 {offsets = [0, 192], sizes = [16, 5], strides = [1, 1]} : vector<16x256xf32> to vector<16x5xf32>
    %234 = vector.extract_strided_slice %229 {offsets = [8, 197], sizes = [1, 5], strides = [1, 1]} : vector<16x256xf32> to vector<1x5xf32>
    %235 = vector.broadcast %234 : vector<1x5xf32> to vector<16x5xf32>
    %236 = arith.addf %233, %235 : vector<16x5xf32>
    %cst_56 = arith.constant 0.000000e+00 : f32
    %237 = vector.broadcast %cst_56 : f32 to vector<16x5xf32>
    %238 = arith.cmpf oge, %236, %237 : vector<16x5xf32>
    %cst_57 = arith.constant 2.000000e-01 : f32
    %239 = vector.broadcast %cst_57 : f32 to vector<16x5xf32>
    %240 = arith.mulf %236, %239 : vector<16x5xf32>
    %241 = arith.select %238, %236, %240 : vector<16x5xi1>, vector<16x5xf32>
    %cst_58 = arith.constant -1.000000e+30 : f32
    %242 = vector.shape_cast %71 : vector<16x1xi1> to vector<16x1xi1>
    %243 = vector.broadcast %242 : vector<16x1xi1> to vector<16x5xi1>
    %244 = vector.broadcast %cst_58 : f32 to vector<16x5xf32>
    %245 = arith.select %243, %241, %244 : vector<16x5xi1>, vector<16x5xf32>
    %cst_59 = arith.constant dense<0xFF800000> : vector<5xf32>
    %246 = vector.multi_reduction <maximumf>, %245, %cst_59 [0] : vector<16x5xf32> to vector<5xf32>
    %247 = vector.shape_cast %246 : vector<5xf32> to vector<1x5xf32>
    %248 = vector.broadcast %247 : vector<1x5xf32> to vector<16x5xf32>
    %249 = arith.subf %245, %248 : vector<16x5xf32>
    %250 = math.exp %249 : vector<16x5xf32>
    %cst_60 = arith.constant dense<0.000000e+00> : vector<5xf32>
    %251 = vector.multi_reduction <add>, %250, %cst_60 [0] : vector<16x5xf32> to vector<5xf32>
    %252 = vector.shape_cast %251 : vector<5xf32> to vector<1x5xf32>
    %253 = tpu.reciprocal %252 {approx = true} : vector<1x5xf32> -> vector<1x5xf32>
    %254 = vector.broadcast %253 : vector<1x5xf32> to vector<16x5xf32>
    %255 = arith.mulf %250, %254 : vector<16x5xf32>
    %cst_61 = arith.constant 0.000000e+00 : f32
    %256 = vector.broadcast %cst_61 : f32 to vector<1x32xf32>
    %257 = vector.extract_strided_slice %255 {offsets = [0, 0], sizes = [16, 1], strides = [1, 1]} : vector<16x5xf32> to vector<16x1xf32>
    %258 = vector.extract_strided_slice %229 {offsets = [0, 0], sizes = [16, 32], strides = [1, 1]} : vector<16x256xf32> to vector<16x32xf32>
    %259 = vector.broadcast %257 : vector<16x1xf32> to vector<16x32xf32>
    %260 = arith.mulf %259, %258 : vector<16x32xf32>
    %cst_62 = arith.constant dense<0.000000e+00> : vector<32xf32>
    %261 = vector.multi_reduction <add>, %260, %cst_62 [0] : vector<16x32xf32> to vector<32xf32>
    %262 = vector.shape_cast %261 : vector<32xf32> to vector<1x32xf32>
    %263 = arith.addf %256, %262 : vector<1x32xf32>
    %264 = vector.extract_strided_slice %255 {offsets = [0, 1], sizes = [16, 1], strides = [1, 1]} : vector<16x5xf32> to vector<16x1xf32>
    %265 = vector.extract_strided_slice %229 {offsets = [0, 32], sizes = [16, 32], strides = [1, 1]} : vector<16x256xf32> to vector<16x32xf32>
    %266 = vector.broadcast %264 : vector<16x1xf32> to vector<16x32xf32>
    %267 = arith.mulf %266, %265 : vector<16x32xf32>
    %cst_63 = arith.constant dense<0.000000e+00> : vector<32xf32>
    %268 = vector.multi_reduction <add>, %267, %cst_63 [0] : vector<16x32xf32> to vector<32xf32>
    %269 = vector.shape_cast %268 : vector<32xf32> to vector<1x32xf32>
    %270 = arith.addf %263, %269 : vector<1x32xf32>
    %271 = vector.extract_strided_slice %255 {offsets = [0, 2], sizes = [16, 1], strides = [1, 1]} : vector<16x5xf32> to vector<16x1xf32>
    %272 = vector.extract_strided_slice %229 {offsets = [0, 64], sizes = [16, 32], strides = [1, 1]} : vector<16x256xf32> to vector<16x32xf32>
    %273 = vector.broadcast %271 : vector<16x1xf32> to vector<16x32xf32>
    %274 = arith.mulf %273, %272 : vector<16x32xf32>
    %cst_64 = arith.constant dense<0.000000e+00> : vector<32xf32>
    %275 = vector.multi_reduction <add>, %274, %cst_64 [0] : vector<16x32xf32> to vector<32xf32>
    %276 = vector.shape_cast %275 : vector<32xf32> to vector<1x32xf32>
    %277 = arith.addf %270, %276 : vector<1x32xf32>
    %278 = vector.extract_strided_slice %255 {offsets = [0, 3], sizes = [16, 1], strides = [1, 1]} : vector<16x5xf32> to vector<16x1xf32>
    %279 = vector.extract_strided_slice %229 {offsets = [0, 96], sizes = [16, 32], strides = [1, 1]} : vector<16x256xf32> to vector<16x32xf32>
    %280 = vector.broadcast %278 : vector<16x1xf32> to vector<16x32xf32>
    %281 = arith.mulf %280, %279 : vector<16x32xf32>
    %cst_65 = arith.constant dense<0.000000e+00> : vector<32xf32>
    %282 = vector.multi_reduction <add>, %281, %cst_65 [0] : vector<16x32xf32> to vector<32xf32>
    %283 = vector.shape_cast %282 : vector<32xf32> to vector<1x32xf32>
    %284 = arith.addf %277, %283 : vector<1x32xf32>
    %285 = vector.extract_strided_slice %255 {offsets = [0, 4], sizes = [16, 1], strides = [1, 1]} : vector<16x5xf32> to vector<16x1xf32>
    %286 = vector.extract_strided_slice %229 {offsets = [0, 128], sizes = [16, 32], strides = [1, 1]} : vector<16x256xf32> to vector<16x32xf32>
    %287 = vector.broadcast %285 : vector<16x1xf32> to vector<16x32xf32>
    %288 = arith.mulf %287, %286 : vector<16x32xf32>
    %cst_66 = arith.constant dense<0.000000e+00> : vector<32xf32>
    %289 = vector.multi_reduction <add>, %288, %cst_66 [0] : vector<16x32xf32> to vector<32xf32>
    %290 = vector.shape_cast %289 : vector<32xf32> to vector<1x32xf32>
    %291 = arith.addf %284, %290 : vector<1x32xf32>
    %cst_67 = arith.constant 2.000000e-01 : f32
    %292 = vector.broadcast %cst_67 : f32 to vector<1x32xf32>
    %293 = arith.mulf %291, %292 : vector<1x32xf32>
    %294 = arith.addf %293, %6 : vector<1x32xf32>
    %295 = vector.shape_cast %73 : vector<16x1xi1> to vector<16x1xi1>
    %296 = vector.broadcast %295 : vector<16x1xi1> to vector<16x32xi1>
    %297 = vector.shape_cast %294 : vector<1x32xf32> to vector<1x32xf32>
    %298 = vector.broadcast %297 : vector<1x32xf32> to vector<16x32xf32>
    %299 = arith.select %296, %298, %232 : vector<16x32xi1>, vector<16x32xf32>
    %cst_68 = arith.constant 0.000000e+00 : f32
    %300 = vector.broadcast %cst_68 : f32 to vector<16x32xf32>
    %301 = arith.cmpf oge, %299, %300 : vector<16x32xf32>
    %cst_69 = arith.constant 0.00999999977 : f32
    %302 = vector.broadcast %cst_69 : f32 to vector<16x32xf32>
    %303 = arith.mulf %299, %302 : vector<16x32xf32>
    %304 = arith.select %301, %299, %303 : vector<16x32xi1>, vector<16x32xf32>
    %305 = vector.extract_strided_slice %228 {offsets = [16, 0], sizes = [16, 256], strides = [1, 1]} : vector<32x256xf32> to vector<16x256xf32>
    %306 = vector.extract_strided_slice %305 {offsets = [0, 160], sizes = [16, 32], strides = [1, 1]} : vector<16x256xf32> to vector<16x32xf32>
    %307 = vector.broadcast %6 : vector<1x32xf32> to vector<16x32xf32>
    %308 = arith.addf %306, %307 : vector<16x32xf32>
    %309 = vector.extract_strided_slice %305 {offsets = [0, 192], sizes = [16, 5], strides = [1, 1]} : vector<16x256xf32> to vector<16x5xf32>
    %310 = vector.extract_strided_slice %305 {offsets = [8, 197], sizes = [1, 5], strides = [1, 1]} : vector<16x256xf32> to vector<1x5xf32>
    %311 = vector.broadcast %310 : vector<1x5xf32> to vector<16x5xf32>
    %312 = arith.addf %309, %311 : vector<16x5xf32>
    %cst_70 = arith.constant 0.000000e+00 : f32
    %313 = vector.broadcast %cst_70 : f32 to vector<16x5xf32>
    %314 = arith.cmpf oge, %312, %313 : vector<16x5xf32>
    %cst_71 = arith.constant 2.000000e-01 : f32
    %315 = vector.broadcast %cst_71 : f32 to vector<16x5xf32>
    %316 = arith.mulf %312, %315 : vector<16x5xf32>
    %317 = arith.select %314, %312, %316 : vector<16x5xi1>, vector<16x5xf32>
    %cst_72 = arith.constant -1.000000e+30 : f32
    %318 = vector.shape_cast %71 : vector<16x1xi1> to vector<16x1xi1>
    %319 = vector.broadcast %318 : vector<16x1xi1> to vector<16x5xi1>
    %320 = vector.broadcast %cst_72 : f32 to vector<16x5xf32>
    %321 = arith.select %319, %317, %320 : vector<16x5xi1>, vector<16x5xf32>
    %cst_73 = arith.constant dense<0xFF800000> : vector<5xf32>
    %322 = vector.multi_reduction <maximumf>, %321, %cst_73 [0] : vector<16x5xf32> to vector<5xf32>
    %323 = vector.shape_cast %322 : vector<5xf32> to vector<1x5xf32>
    %324 = vector.broadcast %323 : vector<1x5xf32> to vector<16x5xf32>
    %325 = arith.subf %321, %324 : vector<16x5xf32>
    %326 = math.exp %325 : vector<16x5xf32>
    %cst_74 = arith.constant dense<0.000000e+00> : vector<5xf32>
    %327 = vector.multi_reduction <add>, %326, %cst_74 [0] : vector<16x5xf32> to vector<5xf32>
    %328 = vector.shape_cast %327 : vector<5xf32> to vector<1x5xf32>
    %329 = tpu.reciprocal %328 {approx = true} : vector<1x5xf32> -> vector<1x5xf32>
    %330 = vector.broadcast %329 : vector<1x5xf32> to vector<16x5xf32>
    %331 = arith.mulf %326, %330 : vector<16x5xf32>
    %cst_75 = arith.constant 0.000000e+00 : f32
    %332 = vector.broadcast %cst_75 : f32 to vector<1x32xf32>
    %333 = vector.extract_strided_slice %331 {offsets = [0, 0], sizes = [16, 1], strides = [1, 1]} : vector<16x5xf32> to vector<16x1xf32>
    %334 = vector.extract_strided_slice %305 {offsets = [0, 0], sizes = [16, 32], strides = [1, 1]} : vector<16x256xf32> to vector<16x32xf32>
    %335 = vector.broadcast %333 : vector<16x1xf32> to vector<16x32xf32>
    %336 = arith.mulf %335, %334 : vector<16x32xf32>
    %cst_76 = arith.constant dense<0.000000e+00> : vector<32xf32>
    %337 = vector.multi_reduction <add>, %336, %cst_76 [0] : vector<16x32xf32> to vector<32xf32>
    %338 = vector.shape_cast %337 : vector<32xf32> to vector<1x32xf32>
    %339 = arith.addf %332, %338 : vector<1x32xf32>
    %340 = vector.extract_strided_slice %331 {offsets = [0, 1], sizes = [16, 1], strides = [1, 1]} : vector<16x5xf32> to vector<16x1xf32>
    %341 = vector.extract_strided_slice %305 {offsets = [0, 32], sizes = [16, 32], strides = [1, 1]} : vector<16x256xf32> to vector<16x32xf32>
    %342 = vector.broadcast %340 : vector<16x1xf32> to vector<16x32xf32>
    %343 = arith.mulf %342, %341 : vector<16x32xf32>
    %cst_77 = arith.constant dense<0.000000e+00> : vector<32xf32>
    %344 = vector.multi_reduction <add>, %343, %cst_77 [0] : vector<16x32xf32> to vector<32xf32>
    %345 = vector.shape_cast %344 : vector<32xf32> to vector<1x32xf32>
    %346 = arith.addf %339, %345 : vector<1x32xf32>
    %347 = vector.extract_strided_slice %331 {offsets = [0, 2], sizes = [16, 1], strides = [1, 1]} : vector<16x5xf32> to vector<16x1xf32>
    %348 = vector.extract_strided_slice %305 {offsets = [0, 64], sizes = [16, 32], strides = [1, 1]} : vector<16x256xf32> to vector<16x32xf32>
    %349 = vector.broadcast %347 : vector<16x1xf32> to vector<16x32xf32>
    %350 = arith.mulf %349, %348 : vector<16x32xf32>
    %cst_78 = arith.constant dense<0.000000e+00> : vector<32xf32>
    %351 = vector.multi_reduction <add>, %350, %cst_78 [0] : vector<16x32xf32> to vector<32xf32>
    %352 = vector.shape_cast %351 : vector<32xf32> to vector<1x32xf32>
    %353 = arith.addf %346, %352 : vector<1x32xf32>
    %354 = vector.extract_strided_slice %331 {offsets = [0, 3], sizes = [16, 1], strides = [1, 1]} : vector<16x5xf32> to vector<16x1xf32>
    %355 = vector.extract_strided_slice %305 {offsets = [0, 96], sizes = [16, 32], strides = [1, 1]} : vector<16x256xf32> to vector<16x32xf32>
    %356 = vector.broadcast %354 : vector<16x1xf32> to vector<16x32xf32>
    %357 = arith.mulf %356, %355 : vector<16x32xf32>
    %cst_79 = arith.constant dense<0.000000e+00> : vector<32xf32>
    %358 = vector.multi_reduction <add>, %357, %cst_79 [0] : vector<16x32xf32> to vector<32xf32>
    %359 = vector.shape_cast %358 : vector<32xf32> to vector<1x32xf32>
    %360 = arith.addf %353, %359 : vector<1x32xf32>
    %361 = vector.extract_strided_slice %331 {offsets = [0, 4], sizes = [16, 1], strides = [1, 1]} : vector<16x5xf32> to vector<16x1xf32>
    %362 = vector.extract_strided_slice %305 {offsets = [0, 128], sizes = [16, 32], strides = [1, 1]} : vector<16x256xf32> to vector<16x32xf32>
    %363 = vector.broadcast %361 : vector<16x1xf32> to vector<16x32xf32>
    %364 = arith.mulf %363, %362 : vector<16x32xf32>
    %cst_80 = arith.constant dense<0.000000e+00> : vector<32xf32>
    %365 = vector.multi_reduction <add>, %364, %cst_80 [0] : vector<16x32xf32> to vector<32xf32>
    %366 = vector.shape_cast %365 : vector<32xf32> to vector<1x32xf32>
    %367 = arith.addf %360, %366 : vector<1x32xf32>
    %cst_81 = arith.constant 2.000000e-01 : f32
    %368 = vector.broadcast %cst_81 : f32 to vector<1x32xf32>
    %369 = arith.mulf %367, %368 : vector<1x32xf32>
    %370 = arith.addf %369, %6 : vector<1x32xf32>
    %371 = vector.shape_cast %73 : vector<16x1xi1> to vector<16x1xi1>
    %372 = vector.broadcast %371 : vector<16x1xi1> to vector<16x32xi1>
    %373 = vector.shape_cast %370 : vector<1x32xf32> to vector<1x32xf32>
    %374 = vector.broadcast %373 : vector<1x32xf32> to vector<16x32xf32>
    %375 = arith.select %372, %374, %308 : vector<16x32xi1>, vector<16x32xf32>
    %cst_82 = arith.constant 0.000000e+00 : f32
    %376 = vector.broadcast %cst_82 : f32 to vector<16x32xf32>
    %377 = arith.cmpf oge, %375, %376 : vector<16x32xf32>
    %cst_83 = arith.constant 0.00999999977 : f32
    %378 = vector.broadcast %cst_83 : f32 to vector<16x32xf32>
    %379 = arith.mulf %375, %378 : vector<16x32xf32>
    %380 = arith.select %377, %375, %379 : vector<16x32xi1>, vector<16x32xf32>
    %381 = tpu.concatenate %304, %380 in 0 : vector<16x32xf32>, vector<16x32xf32> -> vector<32x32xf32>
    %382 = vector.extract_strided_slice %381 {offsets = [8, 0], sizes = [1, 32], strides = [1, 1]} : vector<32x32xf32> to vector<1x32xf32>
    %cst_84 = arith.constant 0.699999988 : f32
    %383 = vector.broadcast %cst_84 : f32 to vector<1x32xf32>
    %384 = arith.mulf %382, %383 : vector<1x32xf32>
    %cst_85 = arith.constant 3.000000e-01 : f32
    %385 = vector.broadcast %cst_85 : f32 to vector<1x32xf32>
    %386 = arith.mulf %38, %385 : vector<1x32xf32>
    %387 = arith.addf %384, %386 : vector<1x32xf32>
    %c0_86 = arith.constant 0 : index
    %c0_87 = arith.constant 0 : index
    %388 = vector.load %arg6[%c0_86, %c0_87] : memref<1x64xf32, #tpu.memory_space<vmem>>, vector<1x32xf32>
    tpu.vector_store %arg6[%c0_86, %c0_87], %387 {strides = array<i32>} : memref<1x64xf32, #tpu.memory_space<vmem>>, vector<1x32xf32>,
    %389 = vector.extract_strided_slice %381 {offsets = [24, 0], sizes = [1, 32], strides = [1, 1]} : vector<32x32xf32> to vector<1x32xf32>
    %cst_88 = arith.constant 0.699999988 : f32
    %390 = vector.broadcast %cst_88 : f32 to vector<1x32xf32>
    %391 = arith.mulf %389, %390 : vector<1x32xf32>
    %cst_89 = arith.constant 3.000000e-01 : f32
    %392 = vector.broadcast %cst_89 : f32 to vector<1x32xf32>
    %393 = arith.mulf %68, %392 : vector<1x32xf32>
    %394 = arith.addf %391, %393 : vector<1x32xf32>
    %c0_90 = arith.constant 0 : index
    %c32 = arith.constant 32 : index
    %395 = vector.load %arg6[%c0_90, %c32] : memref<1x64xf32, #tpu.memory_space<vmem>>, vector<1x32xf32>
    tpu.vector_store %arg6[%c0_90, %c32], %394 {strides = array<i32>} : memref<1x64xf32, #tpu.memory_space<vmem>>, vector<1x32xf32>,
    return
  }
  func.func @transform_0(%arg0: i32) -> (i32, i32, i32) {
    %c0_i32 = arith.constant 0 : i32
    %c0_i32_0 = arith.constant 0 : i32
    %c0_i32_1 = arith.constant 0 : i32
    return %arg0, %c0_i32, %c0_i32_0 : i32, i32, i32
  }
  func.func @transform_1(%arg0: i32) -> (i32, i32, i32) {
    %c0_i32 = arith.constant 0 : i32
    %c0_i32_0 = arith.constant 0 : i32
    %c0_i32_1 = arith.constant 0 : i32
    return %arg0, %c0_i32, %c0_i32_0 : i32, i32, i32
  }
  func.func @transform_2(%arg0: i32) -> (i32, i32) {
    %c0_i32 = arith.constant 0 : i32
    %c0_i32_0 = arith.constant 0 : i32
    %c0_i32_1 = arith.constant 0 : i32
    return %c0_i32, %c0_i32_0 : i32, i32
  }
  func.func @transform_3(%arg0: i32) -> (i32, i32) {
    %c0_i32 = arith.constant 0 : i32
    %c0_i32_0 = arith.constant 0 : i32
    %c0_i32_1 = arith.constant 0 : i32
    return %c0_i32, %c0_i32_0 : i32, i32
  }
  func.func @transform_4(%arg0: i32) -> (i32, i32) {
    %c0_i32 = arith.constant 0 : i32
    %c0_i32_0 = arith.constant 0 : i32
    %c0_i32_1 = arith.constant 0 : i32
    return %c0_i32, %c0_i32_0 : i32, i32
  }
  func.func @transform_5(%arg0: i32) -> (i32, i32) {
    %c0_i32 = arith.constant 0 : i32
    %c0_i32_0 = arith.constant 0 : i32
    return %arg0, %c0_i32 : i32, i32
  }
}

</mosaic_0001>

<bundles_post_ra>
// kernel: tpu_custom_call.1
= control target key start
LH: loop header
LB: loop body
LE: loop exit
PB: predicated region body
PF: predicated region fallthrough
CT: control target
= control target key end

     0   :  { %10 = vsyncpa [#allocation3], 0  ;;  %s1745_s0 = inlined_call_operand.vmem [shape: f32[1,32,32], index: 0, kind: input, shape index: {}]   ;;  %s1746_s1 = inlined_call_operand.vmem [shape: f32[1,32,1], index: 1, kind: input, shape index: {}]   ;;  %s1747_s2 = inlined_call_operand.vmem [shape: f32[8,1], index: 2, kind: input, shape index: {}]   ;;  %s1748_s3 = inlined_call_operand.hbm [shape: f32[32,256], index: 3, kind: input, shape index: {}]   ;;  %s1749_s4 = inlined_call_operand.vmem [shape: f32[1,32], index: 4, kind: input, shape index: {}]   ;;  %s1750_s5 = inlined_call_operand.hbm [shape: f32[1,64], index: 5, kind: output, shape index: {}]  }
   0x1   :  { %11 = vsyncpa [#allocation4], 0  ;;  %s1316_s18 = smov [#allocation2]   ;;  %s1268_s22 = scalar_lea.hbm %s1748_s3, 1024 }
   0x2   :  { %s23_s19 = sshll.u32 %s1316_s18, 4  ;;  %p1269_p0 = scmp.ne.s32.totalorder %s1748_s3, %s1268_s22  ;;  %s24_s19 = int_to_ptr.vmem [resolvable:$true] %s23_s19 }
   0x3   :  { %p1272_p1 = scmp.lt.u32.totalorder %s1268_s22, %s1748_s3 }
   0x5   :  { %p1274_p2 = pnand %p1272_p1, %p1269_p0 }
   0x7   :  { %1277 = shalt.err (!%p1274_p2)
}
   0x8   :  { %s1278_s27 = scalar_lea.vmem %s24_s19, 1024  ;;  %p1283_p4 = scmp.lt.s32.totalorder %s24_s19, %s24_s19 }
   0x9   :  { %p1279_p3 = scmp.ne.s32.totalorder %s24_s19, %s1278_s27  ;;  %p1284_p5 = scmp.lt.s32.totalorder %s1278_s27, %s1278_s27 }
   0xb   :  { %p1285_p6 = por %p1284_p5, %p1283_p4 }
   0xd   :  { %p1286_p7 = pnand %p1285_p6, %p1279_p3 }
   0xf   :  { %1289 = shalt.err (!%p1286_p7)
}
  0x10   :  { %s1317_s28 = smov 256   ;;  %s1318_s29 = smov 16  }
  0x11   :  { %29 = dma.hbm_to_vmem [thread:$0]  %s1748_s3, 1024, %s24_s19, [#allocation3], %s1317_s28, %s1317_s28, %s1318_s29  }
  0x12   :  { %1312 = dma.done.wait [#allocation3], 1024  }
  0x13   :  { %1313 = vsyncadd [#allocation3], 4294966272  ;;  %v1319_v0 = vmov 0   ;;  %v39_v1 = vld [vmem:[%s1746_s1] sm:$0xff]  ;;  %vm79_vm0 = vcmask 7168   ;;  %v40_v3 = vld [vmem:[%s1746_s1 + $0x8] sm:$0xff]  ;;  %v181_v46 = vlaneseq }
  0x14   :  { %1192 = vset.pattern.permute.xlu0 %v1319_v0  ;;  %1193 = vset.pattern.permute.xlu1 %v1319_v0  ;;  %v1381_v2 = vld [vmem:[%s1747_s2] sm:$0xff]  ;;  %v1388_v5 = vsel %vm79_vm0, %v39_v1, 0.0  ;;  %v1393_v6 = vld [vmem:[%s1746_s1 + $0x10] sm:$0xff]  ;;  %v42_v7 = vld [vmem:[%s1746_s1 + $0x18] sm:$0xff]  ;;  %v1320_v13 = vmov 0.0   ;;  %vm116_vm1 = vcmask 261120  }
  0x15   :  { %55 = vperm.xlu0 %1192, %v39_v1   ;;  %v77_v4 = vmul.f32 %v1381_v2, %v39_v1  ;;  %v45_v8 = vld [vmem:[#allocation2 + $0x8] sm:$0xff]  ;;  %65 = vperm.xlu1 %1193, %v1393_v6   ;;  %v1401_v9 = vsel %vm79_vm0, %v1393_v6, 0.0  ;;  %v47_v10 = vld [vmem:[#allocation2 + $0x18] sm:$0xff]  ;;  %v44_v11 = vld [vmem:[#allocation2] sm:$0xff]  ;;  %v182_v47 = vshrl.u32 %v181_v46, 7  ;;  %v1322_v59 = vmov 65  }
  0x16   :  { %v46_v12 = vld [vmem:[#allocation2 + $0x10] sm:$0xff]  ;;  %264 = vmatprep.mubr.f32.mxu0 %v1320_v13  ;;  %v1161_v15 = vpack.c.bf16 %v47_v10, %v45_v8  ;;  %v49_v17 = vld [vmem:[#allocation2 + $0x28] sm:$0xff]  ;;  %v51_v18 = vld [vmem:[#allocation2 + $0x38] sm:$0xff]  ;;  %751 = vmatprep.mubr.f32.mxu1 %v1320_v13  ;;  %vm321_vm3 = vcmask 564736   ;;  %s1325_s24 = smov 32   ;;  %vm381_vm8 = vcmask 523520  }
  0x17   :  { %v78_v14 = vmul.f32 2.0, %v77_v4  ;;  %v1163_v16 = vpack.c.bf16 %v46_v12, %v44_v11  ;;  %v48_v19 = vld [vmem:[#allocation2 + $0x20] sm:$0xff]  ;;  %v1165_v20 = vpack.c.bf16 %v51_v18, %v49_v17  ;;  %v50_v21 = vld [vmem:[#allocation2 + $0x30] sm:$0xff]  ;;  %v36_v37 = vld [vmem:[%s1745_s0 + $0x8] sm:$0xff]  ;;  %v1441_v50 = vsub.s32 0, %v182_v47  ;;  %s1328_s25 = smov 96  }
  0x18   :  { %1162 = vmatprep.subr.bf16.mxu0 %v1161_v15  ;;  %v1167_v24 = vpack.c.bf16 %v50_v21, %v48_v19  ;;  %1170 = vmatprep.subr.bf16.mxu1 %v1161_v15  ;;  %v35_v34 = vld [vmem:[%s1745_s0] sm:$0xff]  ;;  %v37_v40 = vld [vmem:[%s1745_s0 + $0x10] sm:$0xff]  ;;  %v38_v44 = vld [vmem:[%s1745_s0 + $0x18] sm:$0xff]  ;;  %s1321_s0 = smov 123   ;;  %v1463_v60 = vadd.s32 8, %v182_v47  ;;  %vm406_vm9 = vcmask 785920  }
  0x19   :  { %v80_v22 = vsel %vm79_vm0, %v78_v14, -inf  ;;  %60 = vperm.xlu0 %1192, %v40_v3   ;;  %70 = vperm.xlu1 %1193, %v42_v7   ;;  %vm431_vm10 = vcmask 1048320   ;;  %s1329_s26 = smov 64  }
  0x1a   :  { %v81_v23 = vrot.slane %v80_v22, 4  ;;  %1164 = vmatpush1.bf16.msra.mxu0 %v1163_v16  ;;  %1172 = vmatpush1.bf16.msra.mxu1 %v1163_v16  ;;  %vm185_vm2 = vcmp.lt.s32.totalorder %v1463_v60, 9  ;;  %vm187_vm12 = vcmp.eq.s32.totalorder %v1463_v60, 8 }
  0x1b   :  { %1166 = vmatprep.subr.bf16.mxu0 %v1165_v20  ;;  %1174 = vmatprep.subr.bf16.mxu1 %v1165_v20 }
  0x1c   :  { %v82_v25 = vmax.f32 %v80_v22, %v81_v23 }
  0x1d   :  { %1195 = vset.pattern.permute.xlu1 %v1322_v59  ;;  %1194 = vset.pattern.permute.xlu0 %v1322_v59 }
  0x1e   :  { %v83_v26 = vrot.slane %v82_v25, 2  ;;  %1168 = vmatpush1.bf16.msra.mxu0 %v1167_v24  ;;  %1176 = vmatpush1.bf16.msra.mxu1 %v1167_v24 }
  0x20   :  { %v84_v27 = vmax.f32 %v82_v25, %v83_v26 }
  0x22   :  { %v85_v28 = vrot.slane %v84_v27, 1 }
  0x24   :  { %v86_v29 = vmax.f32 %v84_v27, %v85_v28 }
  0x26   :  { %v87_v30 = vsub.f32 %v78_v14, %v86_v29 }
  0x28   :  { %v88_v31 = vmul.f32 1.442695, %v87_v30 }
  0x2a   :  { %1231 = vpow2.f32 %v88_v31 }
  0x34   :  { %v1406_v32 = vpop.eup %1231 }
  0x35   :  { %v1410_v33 = vsel %vm79_vm0, %v1406_v32, 0.0 }
  0x94   :  { %v56_v35 = vpop.permute.xlu0 %55  ;;  %v66_v38 = vpop.permute.xlu1 %65 }
  0x95   :  { %v1415_v36 = vmul.f32 %v56_v35, %v35_v34  ;;  %v1427_v42 = vmul.f32 %v66_v38, %v37_v40 }
  0x97   :  { %1153 = vmatmul.mubr.msk.f32.vlgmr.msra.gmra.mrb[0].mxu0 %vm116_vm1, %v1415_v36 }
  0x98   :  { %v61_v39 = vpop.permute.xlu0 %60  ;;  %270 = vmatprep.mubr.f32.mxu0 %v1320_v13  ;;  %v71_v43 = vpop.permute.xlu1 %70 }
  0x99   :  { %v74_v41 = vmul.f32 %v61_v39, %v36_v37  ;;  %v76_v45 = vmul.f32 %v71_v43, %v38_v44 }
  0x9b   :  { %1154 = vmatmul.mubr.msk.f32.gmra.mrb[2].mxu0 %vm116_vm1, %v74_v41 }
  0x9c   :  { %276 = vmatprep.mubr.f32.mxu0 %v1320_v13 }
  0x9f   :  { %1155 = vmatmul.mubr.msk.f32.gmra.mrb[4].mxu0 %vm116_vm1, %v1427_v42 }
  0xa0   :  { %282 = vmatprep.mubr.f32.mxu0 %v1320_v13 }
  0xa3   :  { %1156 = vmatmul.mubr.msk.f32.gmra.mrb[6].mxu0 %vm116_vm1, %v76_v45 }
 0x16a   :  { %v1437_v48 = vpop.f32.mrb[0].mxu0 }
 0x16b   :  { %v1439_v49 = vpop.f32.mrb[1].mxu0 }
 0x16e   :  { %v1443_v51 = vpop.f32.mrb[2].mxu0 }
 0x16f   :  { %v1445_v52 = vpop.f32.mrb[3].mxu0 }
 0x170   :  { %v302_v53 = vrot.slane %v1445_v52, %v1441_v50 }
 0x172   :  { %304 = vrot.lane.b32.xlu0 %v302_v53, %s1321_s0  ;;  %v1450_v54 = vpop.f32.mrb[4].mxu0 }
 0x173   :  { %v1452_v55 = vpop.f32.mrb[5].mxu0 }
 0x176   :  { %v1454_v56 = vpop.f32.mrb[6].mxu0 }
 0x177   :  { %v1456_v57 = vpop.f32.mrb[7].mxu0 }
 0x178   :  { %v497_v58 = vrot.slane %v1456_v57, %v1441_v50 }
 0x17a   :  { %499 = vrot.lane.b32.xlu1 %v497_v58, %s1321_s0 }
 0x1e4   :  { %v305_v61 = vpop.permute.xlu0 %304 }
 0x1e5   :  { %v307_v62 = vadd.f32 %v305_v61, %v1439_v49  ;;  %v308_v63 = vadd.f32 %v305_v61, %v1445_v52 }
 0x1e7   :  { %vm309_vm4 = vcmp.ge.f32.partialorder %v307_v62, 0.0  ;;  %vm310_vm5 = vcmp.ge.f32.partialorder %v308_v63, 0.0  ;;  %v311_v1 = vmul.f32 0.2, %v307_v62  ;;  %v312_v3 = vmul.f32 0.2, %v308_v63 }
 0x1e9   :  { %v313_v4 = vsel %vm309_vm4, %v307_v62, %v311_v1  ;;  %v314_v7 = vsel %vm310_vm5, %v308_v63, %v312_v3 }
 0x1ea   :  { %v320_v8 = vsel %vm185_vm2, %v314_v7, -1e+30  ;;  %v322_v10 = vsel %vm321_vm3, %v313_v4, -inf }
 0x1eb   :  { %v323_v11 = vsel %vm321_vm3, %v320_v8, -inf }
 0x1ec   :  { %v324_v12 = vmax.f32 %v322_v10, %v323_v11  ;;  %v500_v14 = vpop.permute.xlu1 %499 }
 0x1ed   :  { %v502_v15 = vadd.f32 %v500_v14, %v1452_v55  ;;  %v503_v16 = vadd.f32 %v500_v14, %v1456_v57 }
 0x1ee   :  { %v325_v17 = vrot.slane %v324_v12, 4 }
 0x1ef   :  { %vm504_vm6 = vcmp.ge.f32.partialorder %v502_v15, 0.0  ;;  %vm505_vm7 = vcmp.ge.f32.partialorder %v503_v16, 0.0  ;;  %v506_v18 = vmul.f32 0.2, %v502_v15  ;;  %v507_v19 = vmul.f32 0.2, %v503_v16 }
 0x1f0   :  { %v326_v20 = vmax.f32 %v324_v12, %v325_v17 }
 0x1f1   :  { %v508_v21 = vsel %vm504_vm6, %v502_v15, %v506_v18  ;;  %v509_v22 = vsel %vm505_vm7, %v503_v16, %v507_v19 }
 0x1f2   :  { %v327_v23 = vrot.slane %v326_v20, 2  ;;  %v511_v24 = vsel %vm185_vm2, %v509_v22, -1e+30  ;;  %v512_v25 = vsel %vm321_vm3, %v508_v21, -inf }
 0x1f3   :  { %v513_v26 = vsel %vm321_vm3, %v511_v24, -inf }
 0x1f4   :  { %v328_v27 = vmax.f32 %v326_v20, %v327_v23  ;;  %v514_v28 = vmax.f32 %v512_v25, %v513_v26 }
 0x1f6   :  { %v329_v29 = vrot.slane %v328_v27, 1  ;;  %v515_v30 = vrot.slane %v514_v28, 4 }
 0x1f8   :  { %v330_v31 = vmax.f32 %v328_v27, %v329_v29  ;;  %v516_v34 = vmax.f32 %v514_v28, %v515_v30  ;;  %v1323_v27 = vmov 66  }
 0x1fa   :  { %v331_v35 = vsub.f32 %v313_v4, %v330_v31  ;;  %v332_v37 = vsub.f32 %v320_v8, %v330_v31  ;;  %v517_v38 = vrot.slane %v516_v34, 2  ;;  %v1324_v31 = vmov 67  }
 0x1fc   :  { %v333_v39 = vmul.f32 1.442695, %v331_v35  ;;  %v335_v40 = vmul.f32 1.442695, %v332_v37  ;;  %v518_v41 = vmax.f32 %v516_v34, %v517_v38  ;;  %v1489_v34 = vld [vmem:[%s1749_s4] sm:$0x1] }
 0x1fd   :  { %v293_v35 = vrot.slane %v1489_v34, %v1441_v50  ;;  %v1326_v37 = vmov 64   ;;  %v1327_v38 = vmov 68  }
 0x1fe   :  { %1233 = vpow2.f32 %v333_v39  ;;  %v519_v43 = vrot.slane %v518_v41, 1 }
 0x1ff   :  { %1235 = vpow2.f32 %v335_v40 }
 0x200   :  { %v520_v44 = vmax.f32 %v518_v41, %v519_v43 }
 0x202   :  { %v521_v45 = vsub.f32 %v508_v21, %v520_v44  ;;  %v522_v46 = vsub.f32 %v511_v24, %v520_v44 }
 0x204   :  { %v523_v47 = vmul.f32 1.442695, %v521_v45  ;;  %v525_v53 = vmul.f32 1.442695, %v522_v46 }
 0x206   :  { %1237 = vpow2.f32 %v523_v47 }
 0x207   :  { %1239 = vpow2.f32 %v525_v53 }
 0x208   :  { %v1234_v58 = vpop.eup %1233 }
 0x209   :  { %v1236_v61 = vpop.eup %1235  ;;  %v337_v62 = vsel %vm321_vm3, %v1234_v58, 0.0 }
 0x20a   :  { %v338_v63 = vsel %vm321_vm3, %v1236_v61, 0.0 }
 0x20b   :  { %v339_v1 = vadd.f32 %v338_v63, %v337_v62 }
 0x20d   :  { %v340_v3 = vrot.slane %v339_v1, 4 }
 0x20f   :  { %v341_v4 = vadd.f32 %v340_v3, %v339_v1 }
 0x210   :  { %v1238_v7 = vpop.eup %1237 }
 0x211   :  { %v1240_v8 = vpop.eup %1239  ;;  %v342_v10 = vrot.slane %v341_v4, 2  ;;  %v527_v11 = vsel %vm321_vm3, %v1238_v7, 0.0 }
 0x212   :  { %v528_v12 = vsel %vm321_vm3, %v1240_v8, 0.0 }
 0x213   :  { %v343_v14 = vadd.f32 %v342_v10, %v341_v4  ;;  %v529_v15 = vadd.f32 %v528_v12, %v527_v11 }
 0x215   :  { %v530_v16 = vrot.slane %v529_v15, 4  ;;  %v344_v17 = vrot.slane %v343_v14, 1 }
 0x217   :  { %v531_v18 = vadd.f32 %v530_v16, %v529_v15  ;;  %v345_v19 = vadd.f32 %v344_v17, %v343_v14 }
 0x219   :  { %v532_v20 = vrot.slane %v531_v18, 2  ;;  %1241 = vrcp.f32 %v345_v19 }
 0x21b   :  { %v533_v21 = vadd.f32 %v532_v20, %v531_v18 }
 0x21d   :  { %v534_v22 = vrot.slane %v533_v21, 1 }
 0x21f   :  { %v535_v23 = vadd.f32 %v534_v22, %v533_v21 }
 0x221   :  { %1243 = vrcp.f32 %v535_v23 }
 0x223   :  { %v1242_v24 = vpop.eup %1241 }
 0x224   :  { %v347_v25 = vmul.f32 %v1242_v24, %v1234_v58  ;;  %v348_v26 = vmul.f32 %v1242_v24, %v1236_v61 }
 0x226   :  { %372 = vperm.xlu0 %1194, %v347_v25   ;;  %376 = vperm.xlu1 %1195, %v348_v26  }
 0x22a   :  { %1197 = vset.pattern.permute.xlu0 %v1323_v27  ;;  %1196 = vset.pattern.permute.xlu1 %v1323_v27 }
 0x22b   :  { %v1244_v28 = vpop.eup %1243  ;;  %401 = vperm.xlu0 %1197, %v348_v26   ;;  %397 = vperm.xlu1 %1196, %v347_v25  }
 0x22c   :  { %v537_v29 = vmul.f32 %v1244_v28, %v1238_v7  ;;  %v538_v30 = vmul.f32 %v1244_v28, %v1240_v8 }
 0x22f   :  { %1199 = vset.pattern.permute.xlu0 %v1322_v59  ;;  %1198 = vset.pattern.permute.xlu1 %v1324_v31 }
 0x230   :  { %422 = vperm.xlu1 %1198, %v347_v25   ;;  %562 = vperm.xlu0 %1199, %v537_v29  }
 0x234   :  { %426 = vperm.xlu1 %1198, %v348_v26   ;;  %1202 = vset.pattern.permute.xlu0 %v1323_v27 }
 0x235   :  { %590 = vperm.xlu0 %1202, %v538_v30  }
 0x238   :  { %1200 = vset.pattern.permute.xlu1 %v1322_v59 }
 0x239   :  { %566 = vperm.xlu1 %1200, %v538_v30   ;;  %294 = vrot.lane.b32.xlu0 %v293_v35, %s1325_s24 }
 0x23a   :  { %1205 = vset.pattern.permute.xlu0 %v1326_v37 }
 0x23d   :  { %1201 = vset.pattern.permute.xlu1 %v1323_v27  ;;  %356 = vperm.xlu0 %1205, %v348_v26  }
 0x23e   :  { %586 = vperm.xlu1 %1201, %v537_v29  }
 0x241   :  { %541 = vperm.xlu0 %1205, %v537_v29  }
 0x242   :  { %1203 = vset.pattern.permute.xlu1 %v1324_v31 }
 0x243   :  { %610 = vperm.xlu1 %1203, %v537_v29  }
 0x245   :  { %1208 = vset.pattern.permute.xlu0 %v1327_v38 }
 0x246   :  { %634 = vperm.xlu0 %1208, %v537_v29  }
 0x247   :  { %614 = vperm.xlu1 %1203, %v538_v30  }
 0x24a   :  { %1211 = vset.pattern.permute.xlu0 %v1322_v59 }
 0x24b   :  { %1204 = vset.pattern.permute.xlu1 %v1326_v37 }
 0x24c   :  { %351 = vperm.xlu1 %1204, %v347_v25  }
 0x250   :  { %1206 = vset.pattern.permute.xlu1 %v1327_v38 }
 0x251   :  { %447 = vperm.xlu1 %1206, %v347_v25  }
 0x255   :  { %451 = vperm.xlu1 %1206, %v348_v26  }
 0x259   :  { %1207 = vset.pattern.permute.xlu1 %v1326_v37 }
 0x25a   :  { %546 = vperm.xlu1 %1207, %v538_v30  }
 0x25e   :  { %1209 = vset.pattern.permute.xlu1 %v1327_v38 }
 0x25f   :  { %638 = vperm.xlu1 %1209, %v538_v30  }
 0x263   :  { %1210 = vset.pattern.permute.xlu1 %v1322_v59 }
 0x2a5   :  { %v373_v39 = vpop.permute.xlu0 %372  ;;  %v377_v40 = vpop.permute.xlu1 %376 }
 0x2a6   :  { %v379_v41 = vmul.f32 %v373_v39, %v1437_v48  ;;  %v380_v43 = vmul.f32 %v377_v40, %v1443_v51 }
 0x2a8   :  { %v382_v44 = vsel %vm381_vm8, %v379_v41, 0.0  ;;  %v383_v45 = vsel %vm381_vm8, %v380_v43, 0.0 }
 0x2a9   :  { %v384_v46 = vadd.f32 %v383_v45, %v382_v44 }
 0x2aa   :  { %v402_v47 = vpop.permute.xlu0 %401  ;;  %v398_v53 = vpop.permute.xlu1 %397 }
 0x2ab   :  { %v385_v58 = vrot.slane %v384_v46, 4  ;;  %v405_v61 = vmul.f32 %v402_v47, %v1443_v51  ;;  %v404_v62 = vmul.f32 %v398_v53, %v1437_v48 }
 0x2ad   :  { %v386_v63 = vadd.f32 %v385_v58, %v384_v46  ;;  %v408_v1 = vsel %vm406_vm9, %v405_v61, 0.0  ;;  %v407_v3 = vsel %vm406_vm9, %v404_v62, 0.0 }
 0x2ae   :  { %v409_v4 = vadd.f32 %v408_v1, %v407_v3 }
 0x2af   :  { %v387_v7 = vrot.slane %v386_v63, 2  ;;  %v423_v8 = vpop.permute.xlu1 %422  ;;  %v563_v15 = vpop.permute.xlu0 %562 }
 0x2b0   :  { %v410_v10 = vrot.slane %v409_v4, 4  ;;  %v429_v14 = vmul.f32 %v423_v8, %v1437_v48  ;;  %v569_v24 = vmul.f32 %v563_v15, %v1450_v54 }
 0x2b1   :  { %v388_v11 = vadd.f32 %v387_v7, %v386_v63 }
 0x2b2   :  { %v411_v12 = vadd.f32 %v410_v10, %v409_v4  ;;  %v432_v21 = vsel %vm431_vm10, %v429_v14, 0.0  ;;  %v571_v40 = vsel %vm381_vm8, %v569_v24, 0.0 }
 0x2b3   :  { %v427_v16 = vpop.permute.xlu1 %426  ;;  %v389_v17 = vrot.slane %v388_v11, 1 }
 0x2b4   :  { %v412_v18 = vrot.slane %v411_v12, 2  ;;  %v430_v19 = vmul.f32 %v427_v16, %v1443_v51  ;;  %v591_v30 = vpop.permute.xlu0 %590 }
 0x2b5   :  { %v390_v20 = vadd.f32 %v389_v17, %v388_v11  ;;  %v594_v44 = vmul.f32 %v591_v30, %v1454_v56 }
 0x2b6   :  { %v433_v22 = vsel %vm431_vm10, %v430_v19, 0.0  ;;  %v413_v23 = vadd.f32 %v412_v18, %v411_v12 }
 0x2b7   :  { %v434_v25 = vadd.f32 %v433_v22, %v432_v21  ;;  %392 = vrot.lane.b32.xlu1 %v390_v20, %s1328_s25  ;;  %v596_v62 = vsel %vm406_vm9, %v594_v44, 0.0 }
 0x2b8   :  { %v567_v26 = vpop.permute.xlu1 %566  ;;  %v414_v28 = vrot.slane %v413_v23, 1  ;;  %v1528_v3 = vpop.permute.xlu0 %294 }
 0x2b9   :  { %v435_v29 = vrot.slane %v434_v25, 4  ;;  %v570_v35 = vmul.f32 %v567_v26, %v1454_v56 }
 0x2ba   :  { %v415_v39 = vadd.f32 %v414_v28, %v413_v23 }
 0x2bb   :  { %v436_v41 = vadd.f32 %v435_v29, %v434_v25  ;;  %v572_v43 = vsel %vm381_vm8, %v570_v35, 0.0 }
 0x2bc   :  { %v573_v45 = vadd.f32 %v572_v43, %v571_v40  ;;  %417 = vrot.lane.b32.xlu0 %v415_v39, %s1329_s26  ;;  %v357_v19 = vpop.permute.xlu0 %356  ;;  %v297_v40 = vadd.f32 %v1528_v3, %v1439_v49 }
 0x2bd   :  { %v437_v46 = vrot.slane %v436_v41, 2  ;;  %v587_v47 = vpop.permute.xlu1 %586  ;;  %v360_v26 = vmul.f32 %v357_v19, %v1443_v51 }
 0x2be   :  { %v574_v53 = vrot.slane %v573_v45, 4  ;;  %v593_v58 = vmul.f32 %v587_v47, %v1450_v54 }
 0x2bf   :  { %v438_v61 = vadd.f32 %v437_v46, %v436_v41  ;;  %v362_v43 = vsel %vm116_vm1, %v360_v26, 0.0 }
 0x2c0   :  { %v575_v63 = vadd.f32 %v574_v53, %v573_v45  ;;  %v595_v1 = vsel %vm406_vm9, %v593_v58, 0.0  ;;  %v298_v53 = vadd.f32 %v1528_v3, %v1445_v52 }
 0x2c1   :  { %v597_v4 = vadd.f32 %v596_v62, %v595_v1  ;;  %v439_v7 = vrot.slane %v438_v61, 1 }
 0x2c2   :  { %v576_v8 = vrot.slane %v575_v63, 2  ;;  %v611_v10 = vpop.permute.xlu1 %610 }
 0x2c3   :  { %v598_v11 = vrot.slane %v597_v4, 4  ;;  %v440_v12 = vadd.f32 %v439_v7, %v438_v61  ;;  %v617_v16 = vmul.f32 %v611_v10, %v1450_v54  ;;  %v542_v61 = vpop.permute.xlu0 %541 }
 0x2c4   :  { %v577_v14 = vadd.f32 %v576_v8, %v575_v63  ;;  %v493_v63 = vadd.f32 %v1528_v3, %v1456_v57 }
 0x2c5   :  { %v599_v15 = vadd.f32 %v598_v11, %v597_v4  ;;  %442 = vrot.lane.b32.xlu1 %v440_v12, %s1325_s24  ;;  %v619_v23 = vsel %vm431_vm10, %v617_v16, 0.0  ;;  %v549_v11 = vmul.f32 %v542_v61, %v1450_v54  ;;  %v492_v16 = vadd.f32 %v1528_v3, %v1452_v55 }
 0x2c6   :  { %v615_v17 = vpop.permute.xlu1 %614  ;;  %v578_v18 = vrot.slane %v577_v14, 1 }
 0x2c7   :  { %v600_v20 = vrot.slane %v599_v15, 2  ;;  %v618_v21 = vmul.f32 %v615_v17, %v1454_v56 }
 0x2c8   :  { %v579_v22 = vadd.f32 %v578_v18, %v577_v14  ;;  %v635_v14 = vpop.permute.xlu0 %634 }
 0x2c9   :  { %v620_v24 = vsel %vm431_vm10, %v618_v21, 0.0  ;;  %v601_v25 = vadd.f32 %v600_v20, %v599_v15  ;;  %v641_v18 = vmul.f32 %v635_v14, %v1452_v55 }
 0x2ca   :  { %v621_v28 = vadd.f32 %v620_v24, %v619_v23  ;;  %581 = vrot.lane.b32.xlu0 %v579_v22, %s1328_s25 }
 0x2cb   :  { %v352_v29 = vpop.permute.xlu1 %351  ;;  %v602_v30 = vrot.slane %v601_v25, 1  ;;  %v643_v21 = vsel %vm116_vm1, %v641_v18, 0.0 }
 0x2cc   :  { %v622_v35 = vrot.slane %v621_v28, 4  ;;  %v359_v39 = vmul.f32 %v352_v29, %v1437_v48 }
 0x2cd   :  { %v603_v41 = vadd.f32 %v602_v30, %v601_v25 }
 0x2ce   :  { %v623_v44 = vadd.f32 %v622_v35, %v621_v28  ;;  %v361_v45 = vsel %vm116_vm1, %v359_v39, 0.0  ;;  %478 = vrot.lane.b32.xlu0 %v297_v40, %s1328_s25 }
 0x2cf   :  { %v363_v51 = vadd.f32 %v362_v43, %v361_v45  ;;  %605 = vrot.lane.b32.xlu1 %v603_v41, %s1329_s26 }
 0x2d0   :  { %v624_v46 = vrot.slane %v623_v44, 2  ;;  %v448_v47 = vpop.permute.xlu1 %447 }
 0x2d1   :  { %v454_v58 = vmul.f32 %v448_v47, %v1439_v49  ;;  %v364_v23 = vrot.slane %v363_v51, 4 }
 0x2d2   :  { %480 = vrot.lane.b32.xlu0 %v298_v53, %s1328_s25  ;;  %v625_v48 = vadd.f32 %v624_v46, %v623_v44 }
 0x2d3   :  { %v456_v8 = vsel %vm116_vm1, %v454_v58, 0.0  ;;  %v365_v24 = vadd.f32 %v364_v23, %v363_v51 }
 0x2d4   :  { %v452_v62 = vpop.permute.xlu1 %451  ;;  %v626_v1 = vrot.slane %v625_v48, 1 }
 0x2d5   :  { %v455_v4 = vmul.f32 %v452_v62, %v1445_v52  ;;  %v551_v52 = vsel %vm116_vm1, %v549_v11, 0.0  ;;  %v366_v26 = vrot.slane %v365_v24, 2 }
 0x2d6   :  { %663 = vrot.lane.b32.xlu0 %v493_v63, %s1328_s25  ;;  %v627_v7 = vadd.f32 %v626_v1, %v625_v48 }
 0x2d7   :  { %v457_v10 = vsel %vm116_vm1, %v455_v4, 0.0  ;;  %v367_v29 = vadd.f32 %v366_v26, %v365_v24 }
 0x2d8   :  { %v458_v12 = vadd.f32 %v457_v10, %v456_v8  ;;  %629 = vrot.lane.b32.xlu1 %v627_v7, %s1325_s24 }
 0x2d9   :  { %v547_v49 = vpop.permute.xlu1 %546  ;;  %v368_v35 = vrot.slane %v367_v29, 1 }
 0x2da   :  { %v550_v15 = vmul.f32 %v547_v49, %v1454_v56  ;;  %v459_v25 = vrot.slane %v458_v12, 4 }
 0x2db   :  { %v369_v41 = vadd.f32 %v368_v35, %v367_v29 }
 0x2dc   :  { %v552_v17 = vsel %vm116_vm1, %v550_v15, 0.0  ;;  %661 = vrot.lane.b32.xlu1 %v492_v16, %s1328_s25  ;;  %v460_v28 = vadd.f32 %v459_v25, %v458_v12 }
 0x2dd   :  { %v553_v19 = vadd.f32 %v552_v17, %v551_v52 }
 0x2de   :  { %v639_v54 = vpop.permute.xlu1 %638  ;;  %v461_v30 = vrot.slane %v460_v28, 2 }
 0x2df   :  { %v642_v20 = vmul.f32 %v639_v54, %v1456_v57  ;;  %v554_v40 = vrot.slane %v553_v19, 4 }
 0x2e0   :  { %v462_v39 = vadd.f32 %v461_v30, %v460_v28 }
 0x2e1   :  { %v644_v22 = vsel %vm116_vm1, %v642_v20, 0.0  ;;  %v555_v45 = vadd.f32 %v554_v40, %v553_v19 }
 0x2e2   :  { %v645_v56 = vadd.f32 %v644_v22, %v643_v21  ;;  %v463_v57 = vrot.slane %v462_v39, 1 }
 0x2e3   :  { %v556_v51 = vrot.slane %v555_v45, 2 }
 0x2e4   :  { %v646_v47 = vrot.slane %v645_v56, 4  ;;  %v464_v48 = vadd.f32 %v463_v57, %v462_v39 }
 0x2e5   :  { %v557_v4 = vadd.f32 %v556_v51, %v555_v45 }
 0x2e6   :  { %v647_v62 = vadd.f32 %v646_v47, %v645_v56 }
 0x2e7   :  { %v558_v11 = vrot.slane %v557_v4, 1 }
 0x2e8   :  { %v648_v7 = vrot.slane %v647_v62, 2 }
 0x2e9   :  { %v559_v52 = vadd.f32 %v558_v11, %v557_v4 }
 0x2ea   :  { %v649_v15 = vadd.f32 %v648_v7, %v647_v62 }
 0x2ec   :  { %v650_v20 = vrot.slane %v649_v15, 1 }
 0x2ee   :  { %v651_v23 = vadd.f32 %v650_v20, %v649_v15 }
 0x329   :  { %v393_v55 = vpop.permute.xlu1 %392 }
 0x32a   :  { %v395_v44 = vadd.f32 %v393_v55, %v369_v41 }
 0x32e   :  { %v418_v43 = vpop.permute.xlu0 %417 }
 0x32f   :  { %v420_v46 = vadd.f32 %v418_v43, %v395_v44 }
 0x337   :  { %v443_v53 = vpop.permute.xlu1 %442 }
 0x338   :  { %v445_v58 = vadd.f32 %v443_v53, %v420_v46 }
 0x33a   :  { %v465_v61 = vadd.f32 %v464_v48, %v445_v58 }
 0x33c   :  { %v466_v63 = vmul.f32 0.2, %v465_v61  ;;  %v582_v1 = vpop.permute.xlu0 %581 }
 0x33d   :  { %v584_v54 = vadd.f32 %v582_v1, %v559_v52 }
 0x33e   :  { %v467_v8 = vadd.f32 %v466_v63, %v1489_v34 }
 0x340   :  { %v479_v10 = vpop.permute.xlu0 %478  ;;  %v475_v14 = vrot.slane %v467_v8, %v1441_v50  ;;  %v130_v8 = vmul.f32 %v1381_v2, %v1393_v6 }
 0x341   :  { %vm486_vm11 = vcmp.ge.f32.partialorder %v479_v10, 0.0  ;;  %v488_v12 = vmul.f32 0.01, %v479_v10  ;;  %v606_v18 = vpop.permute.xlu1 %605 }
 0x342   :  { %v608_v22 = vadd.f32 %v606_v18, %v584_v54 }
 0x343   :  { %v490_v49 = vsel %vm486_vm11, %v479_v10, %v488_v12 }
 0x344   :  { %1157 = vmatmul.mubr.msk.f32.vlgmr.msra.gmra.mrb[0].mxu1 %vm116_vm1, %v490_v49  ;;  %v481_v16 = vpop.permute.xlu0 %480 }
 0x345   :  { %v485_v17 = vsel %vm187_vm12, %v475_v14, %v481_v16  ;;  %757 = vmatprep.mubr.f32.mxu1 %v1320_v13  ;;  %v131_v14 = vmul.f32 2.0, %v130_v8 }
 0x346   :  { %vm487_vm13 = vcmp.ge.f32.partialorder %v485_v17, 0.0  ;;  %v489_v19 = vmul.f32 0.01, %v485_v17 }
 0x347   :  { %v132_v52 = vsel %vm79_vm0, %v131_v14, -inf }
 0x348   :  { %v491_v21 = vsel %vm487_vm13, %v485_v17, %v489_v19  ;;  %v664_v40 = vpop.permute.xlu0 %663  ;;  %v133_v54 = vrot.slane %v132_v52, 4 }
 0x349   :  { %1158 = vmatmul.mubr.msk.f32.gmra.mrb[2].mxu1 %vm116_vm1, %v491_v21 }
 0x34a   :  { %v630_v56 = vpop.permute.xlu1 %629  ;;  %763 = vmatprep.mubr.f32.mxu1 %v1320_v13 }
 0x34b   :  { %v632_v24 = vadd.f32 %v630_v56, %v608_v22 }
 0x34d   :  { %v652_v25 = vadd.f32 %v651_v23, %v632_v24  ;;  %v134_v23 = vmax.f32 %v132_v52, %v133_v54 }
 0x34e   :  { %v662_v26 = vpop.permute.xlu1 %661 }
 0x34f   :  { %v653_v28 = vmul.f32 0.2, %v652_v25  ;;  %vm669_vm14 = vcmp.ge.f32.partialorder %v662_v26, 0.0  ;;  %v671_v29 = vmul.f32 0.01, %v662_v26 }
 0x351   :  { %v654_v30 = vadd.f32 %v653_v28, %v1489_v34  ;;  %v673_v35 = vsel %vm669_vm14, %v662_v26, %v671_v29 }
 0x352   :  { %1159 = vmatmul.mubr.msk.f32.gmra.mrb[4].mxu1 %vm116_vm1, %v673_v35 }
 0x353   :  { %v658_v39 = vrot.slane %v654_v30, %v1441_v50  ;;  %769 = vmatprep.mubr.f32.mxu1 %v1320_v13 }
 0x355   :  { %v668_v55 = vsel %vm187_vm12, %v658_v39, %v664_v40 }
 0x356   :  { %vm670_vm15 = vcmp.ge.f32.partialorder %v668_v55, 0.0  ;;  %v672_v41 = vmul.f32 0.01, %v668_v55 }
 0x358   :  { %v674_v43 = vsel %vm670_vm15, %v668_v55, %v672_v41  ;;  %v135_v41 = vrot.slane %v134_v23, 2 }
 0x359   :  { %1160 = vmatmul.mubr.msk.f32.gmra.mrb[6].mxu1 %vm116_vm1, %v674_v43 }
 0x417   :  { %v1582_v44 = vpop.f32.mrb[0].mxu1 }
 0x418   :  { %v1584_v57 = vpop.f32.mrb[1].mxu1 }
 0x41c   :  { %v1586_v34 = vpop.f32.mrb[2].mxu1 }
 0x41d   :  { %v1588_v45 = vpop.f32.mrb[3].mxu1 }
 0x41e   :  { %v780_v13 = vrot.slane %v1588_v45, %v1441_v50 }
 0x420   :  { %782 = vrot.lane.b32.xlu0 %v780_v13, %s1321_s0 }
 0x425   :  { %v1593_v46 = vpop.f32.mrb[4].mxu1 }
 0x426   :  { %v1595_v47 = vpop.f32.mrb[5].mxu1 }
 0x42c   :  { %v1597_v53 = vpop.f32.mrb[6].mxu1 }
 0x42d   :  { %v1599_v48 = vpop.f32.mrb[7].mxu1 }
 0x42e   :  { %v954_v58 = vrot.slane %v1599_v48, %v1441_v50 }
 0x430   :  { %956 = vrot.lane.b32.xlu1 %v954_v58, %s1321_s0  ;;  %v136_v58 = vmax.f32 %v134_v23, %v135_v41 }
 0x492   :  { %v783_v51 = vpop.permute.xlu0 %782 }
 0x493   :  { %v785_v61 = vadd.f32 %v783_v51, %v1584_v57  ;;  %v786_v62 = vadd.f32 %v783_v51, %v1588_v45 }
 0x495   :  { %vm787_vm4 = vcmp.ge.f32.partialorder %v785_v61, 0.0  ;;  %vm788_vm5 = vcmp.ge.f32.partialorder %v786_v62, 0.0  ;;  %v789_v63 = vmul.f32 0.2, %v785_v61  ;;  %v790_v1 = vmul.f32 0.2, %v786_v62 }
 0x497   :  { %v791_v4 = vsel %vm787_vm4, %v785_v61, %v789_v63  ;;  %v792_v7 = vsel %vm788_vm5, %v786_v62, %v790_v1  ;;  %v137_v62 = vrot.slane %v136_v58, 1 }
 0x498   :  { %v794_v10 = vsel %vm185_vm2, %v792_v7, -1e+30  ;;  %v795_v11 = vsel %vm321_vm3, %v791_v4, -inf }
 0x499   :  { %v796_v12 = vsel %vm321_vm3, %v794_v10, -inf }
 0x49a   :  { %v797_v49 = vmax.f32 %v795_v11, %v796_v12 }
 0x49c   :  { %v798_v15 = vrot.slane %v797_v49, 4 }
 0x49e   :  { %v799_v16 = vmax.f32 %v797_v49, %v798_v15 }
 0x4a0   :  { %v800_v17 = vrot.slane %v799_v16, 2 }
 0x4a2   :  { %v801_v18 = vmax.f32 %v799_v16, %v800_v17  ;;  %v957_v19 = vpop.permute.xlu1 %956 }
 0x4a3   :  { %v959_v20 = vadd.f32 %v957_v19, %v1595_v47  ;;  %v960_v2 = vadd.f32 %v957_v19, %v1599_v48 }
 0x4a4   :  { %v802_v6 = vrot.slane %v801_v18, 1 }
 0x4a5   :  { %vm961_vm6 = vcmp.ge.f32.partialorder %v959_v20, 0.0  ;;  %vm962_vm7 = vcmp.ge.f32.partialorder %v960_v2, 0.0  ;;  %v963_v21 = vmul.f32 0.2, %v959_v20  ;;  %v964_v22 = vmul.f32 0.2, %v960_v2 }
 0x4a6   :  { %v803_v56 = vmax.f32 %v801_v18, %v802_v6 }
 0x4a7   :  { %v965_v24 = vsel %vm961_vm6, %v959_v20, %v963_v21  ;;  %v966_v25 = vsel %vm962_vm7, %v960_v2, %v964_v22 }
 0x4a8   :  { %v804_v26 = vsub.f32 %v791_v4, %v803_v56  ;;  %v805_v28 = vsub.f32 %v794_v10, %v803_v56  ;;  %v968_v29 = vsel %vm185_vm2, %v966_v25, -1e+30  ;;  %v969_v30 = vsel %vm321_vm3, %v965_v24, -inf }
 0x4a9   :  { %v970_v35 = vsel %vm321_vm3, %v968_v29, -inf  ;;  %v138_v10 = vmax.f32 %v136_v58, %v137_v62 }
 0x4aa   :  { %v806_v39 = vmul.f32 1.442695, %v804_v26  ;;  %v808_v40 = vmul.f32 1.442695, %v805_v28  ;;  %v971_v55 = vmax.f32 %v969_v30, %v970_v35 }
 0x4ab   :  { %v139_v18 = vsub.f32 %v131_v14, %v138_v10 }
 0x4ac   :  { %1245 = vpow2.f32 %v806_v39  ;;  %v972_v43 = vrot.slane %v971_v55, 4 }
 0x4ad   :  { %1247 = vpow2.f32 %v808_v40  ;;  %v140_v20 = vmul.f32 1.442695, %v139_v18 }
 0x4ae   :  { %v973_v13 = vmax.f32 %v971_v55, %v972_v43 }
 0x4b0   :  { %v974_v51 = vrot.slane %v973_v13, 2 }
 0x4b2   :  { %v975_v61 = vmax.f32 %v973_v13, %v974_v51 }
 0x4b4   :  { %v976_v63 = vrot.slane %v975_v61, 1 }
 0x4b6   :  { %v1246_v1 = vpop.eup %1245  ;;  %v977_v4 = vmax.f32 %v975_v61, %v976_v63 }
 0x4b7   :  { %v1248_v7 = vpop.eup %1247  ;;  %v810_v8 = vsel %vm321_vm3, %v1246_v1, 0.0 }
 0x4b8   :  { %v811_v11 = vsel %vm321_vm3, %v1248_v7, 0.0  ;;  %v978_v12 = vsub.f32 %v965_v24, %v977_v4  ;;  %v979_v49 = vsub.f32 %v968_v29, %v977_v4 }
 0x4b9   :  { %v812_v15 = vadd.f32 %v811_v11, %v810_v8 }
 0x4ba   :  { %v980_v16 = vmul.f32 1.442695, %v978_v12  ;;  %v982_v52 = vmul.f32 1.442695, %v979_v49 }
 0x4bb   :  { %v813_v17 = vrot.slane %v812_v15, 4 }
 0x4bc   :  { %1249 = vpow2.f32 %v980_v16 }
 0x4bd   :  { %v814_v19 = vadd.f32 %v813_v17, %v812_v15  ;;  %1251 = vpow2.f32 %v982_v52 }
 0x4be   :  { %1253 = vpow2.f32 %v140_v20 }
 0x4bf   :  { %v815_v54 = vrot.slane %v814_v19, 2 }
 0x4c1   :  { %v816_v2 = vadd.f32 %v815_v54, %v814_v19 }
 0x4c3   :  { %v817_v6 = vrot.slane %v816_v2, 1 }
 0x4c5   :  { %v818_v21 = vadd.f32 %v817_v6, %v816_v2 }
 0x4c6   :  { %v1250_v22 = vpop.eup %1249 }
 0x4c7   :  { %v1252_v56 = vpop.eup %1251  ;;  %v984_v23 = vsel %vm321_vm3, %v1250_v22, 0.0  ;;  %1255 = vrcp.f32 %v818_v21 }
 0x4c8   :  { %v985_v24 = vsel %vm321_vm3, %v1252_v56, 0.0  ;;  %v1254_v14 = vpop.eup %1253 }
 0x4c9   :  { %v986_v25 = vadd.f32 %v985_v24, %v984_v23  ;;  %v142_v35 = vsel %vm79_vm0, %v1254_v14, 0.0 }
 0x4ca   :  { %v143_v43 = vrot.slane %v142_v35, 4 }
 0x4cb   :  { %v987_v26 = vrot.slane %v986_v25, 4 }
 0x4cc   :  { %v144_v58 = vadd.f32 %v143_v43, %v142_v35 }
 0x4cd   :  { %v988_v28 = vadd.f32 %v987_v26, %v986_v25 }
 0x4ce   :  { %v145_v51 = vrot.slane %v144_v58, 2 }
 0x4cf   :  { %v989_v29 = vrot.slane %v988_v28, 2 }
 0x4d0   :  { %v146_v61 = vadd.f32 %v145_v51, %v144_v58 }
 0x4d1   :  { %v1256_v30 = vpop.eup %1255  ;;  %v990_v39 = vadd.f32 %v989_v29, %v988_v28 }
 0x4d2   :  { %v1624_v40 = vmul.f32 %v1256_v30, %v1248_v7  ;;  %v1626_v55 = vmul.f32 %v1256_v30, %v1246_v1  ;;  %v147_v8 = vrot.slane %v146_v61, 1  ;;  %v91_v1 = vrot.slane %v1410_v33, 4 }
 0x4d3   :  { %v991_v41 = vrot.slane %v990_v39, 1 }
 0x4d4   :  { %v148_v7 = vadd.f32 %v147_v8, %v146_v61  ;;  %v92_v12 = vadd.f32 %v91_v1, %v1410_v33 }
 0x4d5   :  { %v992_v13 = vadd.f32 %v991_v41, %v990_v39 }
 0x4d6   :  { %v93_v49 = vrot.slane %v92_v12, 2 }
 0x4d7   :  { %1257 = vrcp.f32 %v992_v13 }
 0x4d8   :  { %1259 = vrcp.f32 %v148_v7  ;;  %v94_v15 = vadd.f32 %v93_v49, %v92_v12 }
 0x4da   :  { %v95_v16 = vrot.slane %v94_v15, 1 }
 0x4e1   :  { %v1258_v62 = vpop.eup %1257 }
 0x4e2   :  { %v995_v63 = vmul.f32 %v1258_v62, %v1252_v56  ;;  %v994_v4 = vmul.f32 %v1258_v62, %v1250_v22  ;;  %v1260_v10 = vpop.eup %1259 }
 0x4e3   :  { %v150_v11 = vmul.f32 %v1260_v10, %v1254_v14  ;;  %v100_v14 = vrot.slane %v1388_v5, 4 }
 0x4e4   :  { %1023 = vperm.xlu0 %1211, %v995_v63   ;;  %1019 = vperm.xlu1 %1210, %v994_v4  }
 0x4e5   :  { %v101_v61 = vadd.f32 %v100_v14, %v1388_v5 }
 0x4e7   :  { %v102_v12 = vrot.slane %v101_v61, 2 }
 0x4e8   :  { %1213 = vset.pattern.permute.xlu0 %v1324_v31  ;;  %1212 = vset.pattern.permute.xlu1 %v1323_v27 }
 0x4e9   :  { %1067 = vperm.xlu0 %1213, %v994_v4   ;;  %1043 = vperm.xlu1 %1212, %v994_v4  }
 0x4ed   :  { %1216 = vset.pattern.permute.xlu0 %v1322_v59  ;;  %1047 = vperm.xlu1 %1212, %v995_v63  }
 0x4ee   :  { %849 = vperm.xlu0 %1216, %v1624_v40  }
 0x4f1   :  { %1214 = vset.pattern.permute.xlu1 %v1324_v31 }
 0x4f2   :  { %1217 = vset.pattern.permute.xlu0 %v1323_v27  ;;  %1071 = vperm.xlu1 %1214, %v995_v63  }
 0x4f3   :  { %869 = vperm.xlu0 %1217, %v1626_v55  }
 0x4f6   :  { %1215 = vset.pattern.permute.xlu1 %v1322_v59  ;;  %v96_v59 = vadd.f32 %v95_v16, %v94_v15 }
 0x4f7   :  { %1220 = vset.pattern.permute.xlu0 %v1324_v31  ;;  %845 = vperm.xlu1 %1215, %v1626_v55  }
 0x4f8   :  { %897 = vperm.xlu0 %1220, %v1624_v40   ;;  %1261 = vrcp.f32 %v96_v59 }
 0x4fb   :  { %1218 = vset.pattern.permute.xlu1 %v1323_v27 }
 0x4fc   :  { %1223 = vset.pattern.permute.xlu0 %v1319_v0  ;;  %873 = vperm.xlu1 %1218, %v1624_v40  }
 0x4fd   :  { %164 = vperm.xlu0 %1223, %v150_v11  }
 0x500   :  { %1219 = vset.pattern.permute.xlu1 %v1324_v31  ;;  %v152_v31 = vrot.slane %v1401_v9, 4 }
 0x501   :  { %893 = vperm.xlu1 %1219, %v1626_v55   ;;  %1226 = vset.pattern.permute.xlu0 %v1326_v37 }
 0x502   :  { %v1262_v33 = vpop.eup %1261  ;;  %v153_v52 = vadd.f32 %v152_v31, %v1401_v9 }
 0x503   :  { %v1650_v27 = vmul.f32 %v1262_v33, %v1406_v32 }
 0x504   :  { %v154_v17 = vrot.slane %v153_v52, 2 }
 0x505   :  { %1221 = vset.pattern.permute.xlu1 %v1326_v37 }
 0x506   :  { %998 = vperm.xlu1 %1221, %v994_v4   ;;  %v155_v18 = vadd.f32 %v154_v17, %v153_v52  ;;  %v103_v17 = vadd.f32 %v102_v12, %v101_v61 }
 0x508   :  { %v156_v19 = vrot.slane %v155_v18, 1 }
 0x50a   :  { %1003 = vperm.xlu1 %1221, %v995_v63   ;;  %v157_v56 = vadd.f32 %v156_v19, %v155_v18 }
 0x50c   :  { %vm158_vm0 = vcmp.eq.f32.partialorder %v157_v56, 0.0 }
 0x50d   :  { %v159_v35 = vsel %vm158_vm0, 1.0, %v157_v56 }
 0x50e   :  { %1222 = vset.pattern.permute.xlu1 %v1327_v38  ;;  %1263 = vrcp.f32 %v159_v35 }
 0x50f   :  { %1091 = vperm.xlu1 %1222, %v994_v4  }
 0x513   :  { %1095 = vperm.xlu1 %1222, %v995_v63  }
 0x517   :  { %1224 = vset.pattern.permute.xlu1 %v1319_v0 }
 0x563   :  { %v1024_v54 = vpop.permute.xlu0 %1023  ;;  %v1020_v20 = vpop.permute.xlu1 %1019 }
 0x564   :  { %v1027_v2 = vmul.f32 %v1024_v54, %v1597_v53  ;;  %v1026_v6 = vmul.f32 %v1020_v20, %v1593_v46 }
 0x566   :  { %v1029_v32 = vsel %vm381_vm8, %v1027_v2, 0.0  ;;  %v1028_v21 = vsel %vm381_vm8, %v1026_v6, 0.0 }
 0x567   :  { %v1030_v22 = vadd.f32 %v1029_v32, %v1028_v21  ;;  %v1264_v32 = vpop.eup %1263 }
 0x568   :  { %v1044_v23 = vpop.permute.xlu1 %1043  ;;  %v1068_v25 = vpop.permute.xlu0 %1067 }
 0x569   :  { %v1031_v24 = vrot.slane %v1030_v22, 4  ;;  %v1050_v9 = vmul.f32 %v1044_v23, %v1593_v46  ;;  %v1074_v13 = vmul.f32 %v1068_v25, %v1593_v46  ;;  %v104_v25 = vrot.slane %v103_v17, 1 }
 0x56b   :  { %v1032_v26 = vadd.f32 %v1031_v24, %v1030_v22  ;;  %v1052_v39 = vsel %vm406_vm9, %v1050_v9, 0.0  ;;  %v1076_v1 = vsel %vm431_vm10, %v1074_v13, 0.0 }
 0x56c   :  { %v1048_v28 = vpop.permute.xlu1 %1047 }
 0x56d   :  { %v1033_v29 = vrot.slane %v1032_v26, 2  ;;  %v1051_v30 = vmul.f32 %v1048_v28, %v1597_v53  ;;  %v850_v51 = vpop.permute.xlu0 %849 }
 0x56e   :  { %v853_v49 = vmul.f32 %v850_v51, %v1586_v34 }
 0x56f   :  { %v1053_v41 = vsel %vm406_vm9, %v1051_v30, 0.0  ;;  %v1034_v43 = vadd.f32 %v1033_v29, %v1032_v26  ;;  %v161_v29 = vmul.f32 8.0, %v1264_v32 }
 0x570   :  { %v1054_v58 = vadd.f32 %v1053_v41, %v1052_v39  ;;  %v855_v18 = vsel %vm381_vm8, %v853_v49, 0.0 }
 0x571   :  { %v1072_v62 = vpop.permute.xlu1 %1071  ;;  %v1035_v63 = vrot.slane %v1034_v43, 1 }
 0x572   :  { %v1055_v4 = vrot.slane %v1054_v58, 4  ;;  %v1075_v8 = vmul.f32 %v1072_v62, %v1597_v53  ;;  %v870_v5 = vpop.permute.xlu0 %869 }
 0x573   :  { %v1036_v7 = vadd.f32 %v1035_v63, %v1034_v43  ;;  %v876_v20 = vmul.f32 %v870_v5, %v1582_v44 }
 0x574   :  { %v1056_v10 = vadd.f32 %v1055_v4, %v1054_v58  ;;  %v1077_v11 = vsel %vm431_vm10, %v1075_v8, 0.0  ;;  %v105_v58 = vadd.f32 %v104_v25, %v103_v17  ;;  %v950_v8 = vadd.f32 %v1599_v48, %v1528_v3 }
 0x575   :  { %v1078_v15 = vadd.f32 %v1077_v11, %v1076_v1  ;;  %1038 = vrot.lane.b32.xlu1 %v1036_v7, %s1328_s25  ;;  %v878_v9 = vsel %vm406_vm9, %v876_v20, 0.0 }
 0x576   :  { %v1057_v16 = vrot.slane %v1056_v10, 2  ;;  %v846_v59 = vpop.permute.xlu1 %845  ;;  %vm106_vm2 = vcmp.eq.f32.partialorder %v105_v58, 0.0 }
 0x577   :  { %v1079_v33 = vrot.slane %v1078_v15, 4  ;;  %v852_v31 = vmul.f32 %v846_v59, %v1582_v44  ;;  %v898_v56 = vpop.permute.xlu0 %897 }
 0x578   :  { %v1058_v52 = vadd.f32 %v1057_v16, %v1056_v10  ;;  %v901_v30 = vmul.f32 %v898_v56, %v1586_v34 }
 0x579   :  { %v1080_v19 = vadd.f32 %v1079_v33, %v1078_v15  ;;  %v854_v54 = vsel %vm381_vm8, %v852_v31, 0.0  ;;  %v107_v15 = vsel %vm106_vm2, 1.0, %v105_v58  ;;  %vm1127_vm8 = vcmask 253952  }
 0x57a   :  { %v856_v2 = vadd.f32 %v855_v18, %v854_v54  ;;  %v1059_v6 = vrot.slane %v1058_v52, 1  ;;  %v903_v62 = vsel %vm431_vm10, %v901_v30, 0.0  ;;  %1265 = vrcp.f32 %v107_v15 }
 0x57b   :  { %v1081_v21 = vrot.slane %v1080_v19, 2  ;;  %v874_v22 = vpop.permute.xlu1 %873 }
 0x57c   :  { %v877_v23 = vmul.f32 %v874_v22, %v1586_v34  ;;  %v1060_v24 = vadd.f32 %v1059_v6, %v1058_v52  ;;  %v857_v28 = vrot.slane %v856_v2, 4 }
 0x57d   :  { %v1082_v26 = vadd.f32 %v1081_v21, %v1080_v19 }
 0x57e   :  { %v879_v14 = vsel %vm406_vm9, %v877_v23, 0.0  ;;  %1062 = vrot.lane.b32.xlu1 %v1060_v24, %s1329_s26  ;;  %v858_v51 = vadd.f32 %v857_v28, %v856_v2  ;;  %vm1136_vm9 = vcmask 516352  }
 0x57f   :  { %v880_v35 = vadd.f32 %v879_v14, %v878_v9  ;;  %v1083_v39 = vrot.slane %v1082_v26, 1 }
 0x580   :  { %v894_v41 = vpop.permute.xlu1 %893  ;;  %v859_v1 = vrot.slane %v858_v51, 2 }
 0x581   :  { %v900_v43 = vmul.f32 %v894_v41, %v1582_v44  ;;  %v1084_v13 = vadd.f32 %v1083_v39, %v1082_v26  ;;  %v881_v61 = vrot.slane %v880_v35, 4  ;;  %v165_v26 = vpop.permute.xlu0 %164 }
 0x582   :  { %177 = vperm.xlu1 %1224, %v161_v29   ;;  %v860_v31 = vadd.f32 %v859_v1, %v858_v51 }
 0x583   :  { %v902_v63 = vsel %vm431_vm10, %v900_v43, 0.0  ;;  %1086 = vrot.lane.b32.xlu0 %v1084_v13, %s1325_s24  ;;  %v882_v10 = vadd.f32 %v881_v61, %v880_v35 }
 0x584   :  { %v904_v4 = vadd.f32 %v903_v62, %v902_v63  ;;  %v861_v19 = vrot.slane %v860_v31, 1  ;;  %v1266_v22 = vpop.eup %1265 }
 0x585   :  { %v999_v7 = vpop.permute.xlu1 %998  ;;  %v883_v5 = vrot.slane %v882_v10, 2 }
 0x586   :  { %v905_v11 = vrot.slane %v904_v4, 4  ;;  %1225 = vset.pattern.permute.xlu1 %v1326_v37  ;;  %v1006_v49 = vmul.f32 %v999_v7, %v1593_v46  ;;  %v862_v6 = vadd.f32 %v861_v19, %v860_v31 }
 0x587   :  { %824 = vperm.xlu1 %1225, %v1626_v55   ;;  %1117 = vrot.lane.b32.xlu0 %v950_v8, %s1328_s25  ;;  %v884_v20 = vadd.f32 %v883_v5, %v882_v10 }
 0x588   :  { %v906_v12 = vadd.f32 %v905_v11, %v904_v4  ;;  %v1008_v37 = vsel %vm116_vm1, %v1006_v49, 0.0  ;;  %v1267_v11 = vld [vmem:[%s1749_s4] sm:$0x1]  ;;  %s1330_s4 = smov [#allocation5]  }
 0x589   :  { %v1004_v16 = vpop.permute.xlu1 %1003  ;;  %v885_v21 = vrot.slane %v884_v20, 1  ;;  %s1144_s29 = sshll.u32 %s1330_s4, 4  ;;  %s1145_s29 = int_to_ptr.vmem [resolvable:$true] %s1144_s29 }
 0x58a   :  { %v907_v59 = vrot.slane %v906_v12, 2  ;;  %v1007_v33 = vmul.f32 %v1004_v16, %v1597_v53  ;;  %s1290_s30 = scalar_lea.vmem %s1145_s29, 16  ;;  %s1294_s6 = scalar_lea.vmem %s1145_s29, 32 }
 0x58b   :  { %1227 = vset.pattern.permute.xlu1 %v1327_v38  ;;  %829 = vperm.xlu0 %1226, %v1624_v40   ;;  %p1291_p8 = scmp.ne.s32.totalorder %s1145_s29, %s1290_s30  ;;  %p1295_p9 = scmp.lt.s32.totalorder %s1145_s29, %s1145_s29 }
 0x58c   :  { %v1009_v52 = vsel %vm116_vm1, %v1007_v33, 0.0  ;;  %917 = vperm.xlu1 %1227, %v1626_v55   ;;  %v908_v17 = vadd.f32 %v907_v59, %v906_v12  ;;  %p1296_p10 = scmp.lt.s32.totalorder %s1294_s6, %s1290_s30 }
 0x58d   :  { %v1010_v46 = vadd.f32 %v1009_v52, %v1008_v37 }
 0x58e   :  { %v1092_v18 = vpop.permute.xlu1 %1091  ;;  %v909_v54 = vrot.slane %v908_v17, 1  ;;  %p1297_p11 = por %p1296_p10, %p1295_p9 }
 0x58f   :  { %1228 = vset.pattern.permute.xlu0 %v1319_v0  ;;  %v1098_v53 = vmul.f32 %v1092_v18, %v1595_v47  ;;  %v1011_v24 = vrot.slane %v1010_v46, 4 }
 0x590   :  { %921 = vperm.xlu1 %1227, %v1624_v40   ;;  %112 = vperm.xlu0 %1228, %v1650_v27   ;;  %v910_v32 = vadd.f32 %v909_v54, %v908_v17  ;;  %v886_v40 = vadd.f32 %v885_v21, %v884_v20  ;;  %v776_v27 = vadd.f32 %v1588_v45, %v1528_v3  ;;  %p1298_p12 = pnand %p1297_p11, %p1291_p8 }
 0x591   :  { %v1100_v56 = vsel %vm116_vm1, %v1098_v53, 0.0  ;;  %v1012_v25 = vadd.f32 %v1011_v24, %v1010_v46 }
 0x592   :  { %v1096_v2 = vpop.permute.xlu1 %1095 }
 0x593   :  { %v1099_v55 = vmul.f32 %v1096_v2, %v1599_v48  ;;  %v109_v48 = vmul.f32 8.0, %v1266_v22  ;;  %v1013_v28 = vrot.slane %v1012_v25, 2 }
 0x594   :  { %864 = vrot.lane.b32.xlu1 %v862_v6, %s1328_s25  ;;  %912 = vrot.lane.b32.xlu0 %v910_v32, %s1325_s24 }
 0x595   :  { %v1101_v23 = vsel %vm116_vm1, %v1099_v55, 0.0  ;;  %1229 = vset.pattern.permute.xlu1 %v1319_v0  ;;  %1230 = vset.pattern.permute.xlu0 %v1327_v38  ;;  %v167_v0 = vmul.f32 %v165_v26, %v1427_v42  ;;  %v1014_v38 = vadd.f32 %v1013_v28, %v1012_v25 }
 0x596   :  { %v1102_v47 = vadd.f32 %v1101_v23, %v1100_v56 }
 0x597   :  { %v168_v29 = vsel %vm116_vm1, %v167_v0, 0.0  ;;  %v1015_v3 = vrot.slane %v1014_v38, 1 }
 0x598   :  { %888 = vrot.lane.b32.xlu1 %v886_v40, %s1329_s26  ;;  %943 = vrot.lane.b32.xlu0 %v776_v27, %s1328_s25  ;;  %v1103_v9 = vrot.slane %v1102_v47, 4  ;;  %v169_v35 = vrot.slane %v168_v29, 4 }
 0x599   :  { %v1016_v13 = vadd.f32 %v1015_v3, %v1014_v38 }
 0x59a   :  { %v1104_v14 = vadd.f32 %v1103_v9, %v1102_v47  ;;  %v170_v43 = vadd.f32 %v169_v35, %v168_v29 }
 0x59c   :  { %126 = vperm.xlu1 %1229, %v109_v48   ;;  %v1105_v30 = vrot.slane %v1104_v14, 2  ;;  %v171_v62 = vrot.slane %v170_v43, 2 }
 0x59e   :  { %v1106_v41 = vadd.f32 %v1105_v30, %v1104_v14  ;;  %v172_v1 = vadd.f32 %v171_v62, %v170_v43 }
 0x5a0   :  { %v1107_v61 = vrot.slane %v1106_v41, 1  ;;  %v173_v49 = vrot.slane %v172_v1, 1 }
 0x5a2   :  { %v1108_v7 = vadd.f32 %v1107_v61, %v1106_v41  ;;  %v174_v59 = vadd.f32 %v173_v49, %v172_v1 }
 0x5e7   :  { %v1039_v39 = vpop.permute.xlu1 %1038 }
 0x5e8   :  { %v1041_v51 = vadd.f32 %v1039_v39, %v1016_v13 }
 0x5f0   :  { %v1063_v58 = vpop.permute.xlu1 %1062 }
 0x5f1   :  { %v1065_v63 = vadd.f32 %v1063_v58, %v1041_v51 }
 0x5f5   :  { %v1087_v4 = vpop.permute.xlu0 %1086 }
 0x5f6   :  { %v1089_v8 = vadd.f32 %v1087_v4, %v1065_v63 }
 0x5f8   :  { %v1109_v42 = vadd.f32 %v1108_v7, %v1089_v8 }
 0x5f9   :  { %v1118_v16 = vpop.permute.xlu0 %1117 }
 0x5fa   :  { %v1110_v10 = vmul.f32 0.2, %v1109_v42 }
 0x5fc   :  { %v1111_v12 = vadd.f32 %v1267_v11, %v1110_v10 }
 0x5fe   :  { %v1115_v15 = vrot.slane %v1111_v12, %v1441_v50 }
 0x600   :  { %v1120_v5 = vsel %vm187_vm12, %v1115_v15, %v1118_v16 }
 0x601   :  { %vm1121_vm3 = vcmp.ge.f32.partialorder %v1120_v5, 0.0  ;;  %v1122_v33 = vmul.f32 0.01, %v1120_v5  ;;  %v178_v31 = vpop.permute.xlu1 %177 }
 0x602   :  { %v180_v37 = vmul.f32 %v178_v31, %v174_v59 }
 0x603   :  { %v1123_v52 = vsel %vm1121_vm3, %v1120_v5, %v1122_v33 }
 0x604   :  { %v1129_v17 = vmul.f32 0.7, %v1123_v52  ;;  %v1130_v46 = vmul.f32 0.3, %v180_v37 }
 0x606   :  { %v1131_v18 = vadd.f32 %v1130_v46, %v1129_v17  ;;  %v825_v19 = vpop.permute.xlu1 %824 }
 0x607   :  { %v832_v54 = vmul.f32 %v825_v19, %v1582_v44 }
 0x608   :  { %1133 = vrot.lane.b32.xlu1 %v1131_v18, %s1325_s24 }
 0x609   :  { %v834_v6 = vsel %vm116_vm1, %v832_v54, 0.0 }
 0x60a   :  { %v830_v20 = vpop.permute.xlu0 %829 }
 0x60b   :  { %v833_v53 = vmul.f32 %v830_v20, %v1586_v34  ;;  %v918_v2 = vpop.permute.xlu1 %917 }
 0x60c   :  { %v924_v55 = vmul.f32 %v918_v2, %v1584_v57 }
 0x60d   :  { %v835_v32 = vsel %vm116_vm1, %v833_v53, 0.0 }
 0x60e   :  { %v836_v21 = vadd.f32 %v835_v32, %v834_v6  ;;  %v926_v44 = vsel %vm116_vm1, %v924_v55, 0.0 }
 0x60f   :  { %v922_v22 = vpop.permute.xlu1 %921  ;;  %v113_v56 = vpop.permute.xlu0 %112 }
 0x610   :  { %v837_v23 = vrot.slane %v836_v21, 4  ;;  %v925_v47 = vmul.f32 %v922_v22, %v1588_v45  ;;  %v115_v40 = vmul.f32 %v113_v56, %v1415_v36 }
 0x612   :  { %v838_v27 = vadd.f32 %v837_v23, %v836_v21  ;;  %v927_v34 = vsel %vm116_vm1, %v925_v47, 0.0  ;;  %v117_v48 = vsel %vm116_vm1, %v115_v40, 0.0 }
 0x613   :  { %v928_v24 = vadd.f32 %v927_v34, %v926_v44  ;;  %v118_v25 = vrot.slane %v117_v48, 4  ;;  %v865_v14 = vpop.permute.xlu1 %864  ;;  %v913_v13 = vpop.permute.xlu0 %912 }
 0x614   :  { %v839_v26 = vrot.slane %v838_v27, 2 }
 0x615   :  { %v929_v9 = vrot.slane %v928_v24, 4  ;;  %v119_v28 = vadd.f32 %v118_v25, %v117_v48 }
 0x616   :  { %v840_v57 = vadd.f32 %v839_v26, %v838_v27 }
 0x617   :  { %v930_v0 = vadd.f32 %v929_v9, %v928_v24  ;;  %v120_v45 = vrot.slane %v119_v28, 2  ;;  %v889_v39 = vpop.permute.xlu1 %888  ;;  %v944_v1 = vpop.permute.xlu0 %943 }
 0x618   :  { %v841_v38 = vrot.slane %v840_v57, 1 }
 0x619   :  { %v931_v29 = vrot.slane %v930_v0, 2  ;;  %v121_v43 = vadd.f32 %v120_v45, %v119_v28 }
 0x61a   :  { %v842_v30 = vadd.f32 %v841_v38, %v840_v57 }
 0x61b   :  { %v932_v36 = vadd.f32 %v931_v29, %v930_v0  ;;  %v122_v62 = vrot.slane %v121_v43, 1  ;;  %v127_v7 = vpop.permute.xlu1 %126 }
 0x61c   :  { %v867_v35 = vadd.f32 %v865_v14, %v842_v30 }
 0x61d   :  { %v933_v3 = vrot.slane %v932_v36, 1  ;;  %v123_v8 = vadd.f32 %v122_v62, %v121_v43 }
 0x61e   :  { %v891_v41 = vadd.f32 %v889_v39, %v867_v35 }
 0x61f   :  { %v934_v58 = vadd.f32 %v933_v3, %v932_v36  ;;  %v129_v12 = vmul.f32 %v127_v7, %v123_v8 }
 0x620   :  { %v915_v51 = vadd.f32 %v913_v13, %v891_v41 }
 0x621   :  { %v1125_v5 = vmul.f32 0.3, %v129_v12 }
 0x622   :  { %v935_v61 = vadd.f32 %v934_v58, %v915_v51 }
 0x624   :  { %v936_v63 = vmul.f32 0.2, %v935_v61 }
 0x626   :  { %v937_v4 = vadd.f32 %v1267_v11, %v936_v63 }
 0x628   :  { %v941_v42 = vrot.slane %v937_v4, %v1441_v50 }
 0x62a   :  { %v946_v10 = vsel %vm187_vm12, %v941_v42, %v944_v1 }
 0x62b   :  { %vm947_vm1 = vcmp.ge.f32.partialorder %v946_v10, 0.0  ;;  %v948_v49 = vmul.f32 0.01, %v946_v10 }
 0x62d   :  { %v949_v15 = vsel %vm947_vm1, %v946_v10, %v948_v49 }
 0x62e   :  { %v1124_v16 = vmul.f32 0.7, %v949_v15 }
 0x630   :  { %v1126_v59 = vadd.f32 %v1125_v5, %v1124_v16 }
 0x632   :  { %1128 = vst.msk [vmem:[#allocation5] sm:$0x1] %vm1127_vm8, %v1126_v59 }
 0x67a   :  { %v1134_v11 = vpop.permute.xlu1 %1133 }
 0x67b   :  { %1137 = vst.msk [vmem:[#allocation5] sm:$0x1] %vm1136_vm9, %v1134_v11 }
 0x67c   :  { %1301 = shalt.err (!%p1298_p12)
}
 0x67d   :  { %s1302_s9 = scalar_lea.hbm %s1750_s5, 16 }
 0x67e   :  { %p1303_p13 = scmp.ne.s32.totalorder %s1750_s5, %s1302_s9  ;;  %p1306_p0 = scmp.lt.u32.totalorder %s1302_s9, %s1750_s5 }
 0x680   :  { %p1308_p1 = pnand %p1306_p0, %p1303_p13 }
 0x682   :  { %1311 = shalt.err (!%p1308_p1)
}
 0x683   :  { %1147 = dma.vmem_to_hbm [thread:$0]  %s1145_s29, 16, %s1750_s5, [#allocation4]  }
 0x684   :  { %1314 = dma.done.wait [#allocation4], 16  }
 0x685   :  { %1315 = vsyncadd [#allocation4], 4294967280 }
 0x686   :  { %1151 = vsyncpa [#allocation3], 1 }
 0x687   :  { %1152 = vsyncpa [#allocation4], 1 }

</bundles_post_ra>
